<compile_context>
chip_gen: v5e
topology: v5e:2x2
jax: 0.10.0
libtpu: 0.0.40
codegen_flags: <defaults>
</compile_context>

<pallas_src>
import functools
import math

import jax
import jax.numpy as jnp
from jax import lax
from jax.experimental import pallas as pl
from jax.experimental.pallas import tpu as pltpu

# ------------------------- small demo configuration -------------------------
B = 2            # batch (number of prompts)
S = 8            # sequence length (multiple of 8; pad 77 -> 80 at CLIP size)
D = 32           # transformer width
H = 4            # attention heads
E = 16           # text-projection (embedding) dim
E_PAD = 128      # lane-dense padded projection width (unmasked final store)
LAYERS = 2       # transformer depth
EPS = 1e-5       # LayerNorm eps (PyTorch default)
ACT_DTYPE = jnp.float32    # residual stream / LN / softmax / activations
MXU_DTYPE = jnp.bfloat16   # matmul operand & stored weight dtype


def _ln(x, g, b):
    """LayerNorm over the last axis (f32, in-kernel and in the JAX reference)."""
    mu = jnp.mean(x, axis=-1, keepdims=True)
    var = jnp.mean((x - mu) ** 2, axis=-1, keepdims=True)
    return (x - mu) * lax.rsqrt(var + EPS) * g + b


# ------------------------------ fused Pallas kernel --------------------------
def text_encoder_kernel(eot_ref,                                    # SMEM scalar prefetch
                        x_ref, pos_ref,
                        ln1g_ref, ln1b_ref, wqkv_ref, bqkv_ref, wo_ref, bo_ref,
                        ln2g_ref, ln2b_ref, wfc_ref, bfc_ref, wpr_ref, bpr_ref,
                        lnfg_ref, lnfb_ref, proj_ref,
                        o_ref,
                        x_scr, ctx_scr,
                        *, n_head, batch, seq):
    l = pl.program_id(0)
    n_layers = pl.num_programs(0)
    d = x_ref.shape[-1]
    hd = d // n_head
    scale = 1.0 / math.sqrt(hd)

    # ---- first grid step only: prompts + positional embedding -> resident f32 scratch
    @pl.when(l == 0)
    def _():
        x_scr[...] = (x_ref[...] + pos_ref[...]).reshape(batch * seq, d)

    # Causal additive mask built in-kernel (no (S,S) operand DMA'd per layer).
    rows = lax.broadcasted_iota(jnp.int32, (seq, seq), 0)
    cols = lax.broadcasted_iota(jnp.int32, (seq, seq), 1)
    mask = jnp.where(cols > rows, jnp.float32(-1e30), jnp.float32(0.0))

    x = x_scr[...]                                           # (B*S, D) f32

    # ---- attention branch: x + attn(ln_1(x)) ----
    h = _ln(x, ln1g_ref[0], ln1b_ref[0])                     # f32
    qkv = jnp.dot(h.astype(MXU_DTYPE), wqkv_ref[0],
                  preferred_element_type=jnp.float32) + bqkv_ref[0]   # (B*S, 3D) f32

    for b in range(batch):                                   # static (tiny) batch loop
        base = b * seq
        q = qkv[base:base + seq, 0:d] * scale
        k = qkv[base:base + seq, d:2 * d]
        v = qkv[base:base + seq, 2 * d:3 * d]
        for hh in range(n_head):                             # static head loop
            sl = slice(hh * hd, (hh + 1) * hd)
            s = jnp.dot(q[:, sl].astype(MXU_DTYPE), k[:, sl].astype(MXU_DTYPE).T,
                        preferred_element_type=jnp.float32) + mask
            s = s - jnp.max(s, axis=-1, keepdims=True)       # softmax stats in f32
            p = jnp.exp(s)
            p = p * pl.reciprocal(jnp.sum(p, axis=-1, keepdims=True), approx=True)
            hv = jnp.dot(p.astype(MXU_DTYPE), v[:, sl].astype(MXU_DTYPE),
                         preferred_element_type=jnp.float32)          # (S, hd)
            ctx_scr[base:base + seq, sl] = hv                # per-head lane slice, no concat

    # Single full-K output projection after the head loop (restores MXU cadence).
    attn = jnp.dot(ctx_scr[...].astype(MXU_DTYPE), wo_ref[0],
                   preferred_element_type=jnp.float32) + bo_ref[0]
    x = x + attn

    # ---- MLP branch: x + mlp(ln_2(x)), QuickGELU (f32 elementwise) ----
    h2 = _ln(x, ln2g_ref[0], ln2b_ref[0])
    f = jnp.dot(h2.astype(MXU_DTYPE), wfc_ref[0],
                preferred_element_type=jnp.float32) + bfc_ref[0]
    f = f * jax.nn.sigmoid(1.702 * f)
    x = x + jnp.dot(f.astype(MXU_DTYPE), wpr_ref[0],
                    preferred_element_type=jnp.float32) + bpr_ref[0]
    x_scr[...] = x                                            # carry to next grid step

    # ---- last layer only: EOT-row gather, ln_final, @ text_projection (padded) ----
    @pl.when(l == n_layers - 1)
    def _():
        eot_rows = jnp.concatenate(
            [x_scr[pl.ds(eot_ref[b], 1), :] for b in range(batch)], axis=0)   # (B, D)
        rn = _ln(eot_rows, lnfg_ref[...], lnfb_ref[...])
        o_ref[...] = jnp.dot(rn.astype(MXU_DTYPE), proj_ref[...],
                             preferred_element_type=jnp.float32).astype(o_ref.dtype)


# ------------------------------ thin JAX wrapper ------------------------------
def text_encoder_forward(prompts, tokenized_prompts, params):
    b_, s_, d_ = prompts.shape
    n_layers = params["w_qkv"].shape[0]
    e_ = params["proj"].shape[1]

    # EOT position (argmax over tokens) -> flat row index into the (B*S, D) activation.
    eot = jnp.argmax(tokenized_prompts, axis=-1).astype(jnp.int32)
    eot_flat = jnp.arange(b_, dtype=jnp.int32) * s_ + eot          # scalar-prefetch (SMEM)

    # Lane-dense padded text projection; sliced back to E outside the kernel.
    proj_pad = jnp.zeros((d_, E_PAD), MXU_DTYPE).at[:, :e_].set(params["proj"])

    kernel = functools.partial(text_encoder_kernel, n_head=H, batch=b_, seq=s_)

    def wspec(shape):
        # per-layer streamed weight block; Pallas double-buffers the next layer's DMA.
        nd = len(shape)
        return pl.BlockSpec((1,) + shape, lambda l, *_: (l,) + (0,) * nd)

    def cspec(shape):
        # constant block index -> operand stays resident across the layer grid.
        nd = len(shape)
        return pl.BlockSpec(shape, lambda l, *_: (0,) * nd)

    grid_spec = pltpu.PrefetchScalarGridSpec(
        num_scalar_prefetch=1,
        grid=(n_layers,),
        in_specs=[
            cspec((b_, s_, d_)),                       # prompts
            cspec((s_, d_)),                           # positional embedding
            wspec((1, d_)), wspec((1, d_)),            # ln_1 gamma / beta
            wspec((d_, 3 * d_)), wspec((1, 3 * d_)),   # fused W_qkv / b_qkv
            wspec((d_, d_)), wspec((1, d_)),           # W_o / b_o
            wspec((1, d_)), wspec((1, d_)),            # ln_2 gamma / beta
            wspec((d_, 4 * d_)), wspec((1, 4 * d_)),   # W_fc / b_fc
            wspec((4 * d_, d_)), wspec((1, d_)),       # W_proj / b_proj
            cspec((1, d_)), cspec((1, d_)),            # ln_final gamma / beta
            cspec((d_, E_PAD)),                        # padded text_projection
        ],
        out_specs=cspec((b_, E_PAD)),
        scratch_shapes=[pltpu.VMEM((b_ * s_, d_), jnp.float32),   # residual stream x
                        pltpu.VMEM((b_ * s_, d_), jnp.float32)],  # per-head context
    )

    out_pad = pl.pallas_call(
        kernel,
        out_shape=jax.ShapeDtypeStruct((b_, E_PAD), prompts.dtype),
        grid_spec=grid_spec,
        compiler_params=pltpu.CompilerParams(
            dimension_semantics=("arbitrary",)),   # layer axis is sequential
    )(eot_flat, prompts, params["pos_emb"],
      params["ln1_g"], params["ln1_b"], params["w_qkv"], params["b_qkv"],
      params["wo"], params["bo"], params["ln2_g"], params["ln2_b"],
      params["w_fc"], params["b_fc"], params["w_proj"], params["b_proj"],
      params["lnf_g"], params["lnf_b"], proj_pad)
    return out_pad[:, :e_]


# ------------------------------ pure-JAX reference ----------------------------
def reference_forward(prompts, tokenized_prompts, params):
    f32 = jnp.float32
    x = prompts + params["pos_emb"]
    bn, sn, dn = x.shape
    hd = dn // H
    scale = 1.0 / math.sqrt(hd)
    mask = jnp.triu(jnp.full((sn, sn), -jnp.inf, f32), k=1)
    for l in range(LAYERS):
        h = _ln(x, params["ln1_g"][l], params["ln1_b"][l])
        qkv = h @ params["w_qkv"][l].astype(f32) + params["b_qkv"][l]
        q, k, v = qkv[..., :dn], qkv[..., dn:2 * dn], qkv[..., 2 * dn:]
        qh = q.reshape(bn, sn, H, hd).transpose(0, 2, 1, 3)
        kh = k.reshape(bn, sn, H, hd).transpose(0, 2, 1, 3)
        vh = v.reshape(bn, sn, H, hd).transpose(0, 2, 1, 3)
        s = jnp.einsum("bhqd,bhkd->bhqk", qh, kh) * scale + mask
        a = jax.nn.softmax(s, axis=-1)
        o = jnp.einsum("bhqk,bhkd->bhqd", a, vh).transpose(0, 2, 1, 3).reshape(bn, sn, dn)
        x = x + (o @ params["wo"][l].astype(f32) + params["bo"][l])
        h2 = _ln(x, params["ln2_g"][l], params["ln2_b"][l])
        f = h2 @ params["w_fc"][l].astype(f32) + params["b_fc"][l]
        f = f * jax.nn.sigmoid(1.702 * f)
        x = x + (f @ params["w_proj"][l].astype(f32) + params["b_proj"][l])
    xn = _ln(x, params["lnf_g"], params["lnf_b"])
    eot = jnp.argmax(tokenized_prompts, axis=-1)
    return xn[jnp.arange(bn), eot] @ params["proj"].astype(f32)


# --------------------------- deterministic parameters --------------------------
def init_params(key):
    ks = iter(jax.random.split(key, 8 * LAYERS + 4))

    def nrm(shape, dtype, scale=0.02):
        return (scale * jax.random.normal(next(ks), shape)).astype(dtype)

    layers = {k: [] for k in ("ln1_g", "ln1_b", "w_qkv", "b_qkv", "wo", "bo",
                              "ln2_g", "ln2_b", "w_fc", "b_fc", "w_proj", "b_proj")}
    for _ in range(LAYERS):
        layers["ln1_g"].append(jnp.ones((1, D), ACT_DTYPE))
        layers["ln1_b"].append(jnp.zeros((1, D), ACT_DTYPE))
        layers["w_qkv"].append(nrm((D, 3 * D), MXU_DTYPE))   # fused q/k/v, pre-transposed
        layers["b_qkv"].append(nrm((1, 3 * D), ACT_DTYPE))
        layers["wo"].append(nrm((D, D), MXU_DTYPE))
        layers["bo"].append(nrm((1, D), ACT_DTYPE))
        layers["ln2_g"].append(jnp.ones((1, D), ACT_DTYPE))
        layers["ln2_b"].append(jnp.zeros((1, D), ACT_DTYPE))
        layers["w_fc"].append(nrm((D, 4 * D), MXU_DTYPE))
        layers["b_fc"].append(nrm((1, 4 * D), ACT_DTYPE))
        layers["w_proj"].append(nrm((4 * D, D), MXU_DTYPE))
        layers["b_proj"].append(nrm((1, D), ACT_DTYPE))

    params = {k: jnp.stack(v) for k, v in layers.items()}    # (LAYERS, ...)
    params.update({
        "pos_emb": nrm((S, D), ACT_DTYPE),
        "lnf_g": jnp.ones((1, D), ACT_DTYPE),
        "lnf_b": jnp.zeros((1, D), ACT_DTYPE),
        "proj": nrm((D, E), MXU_DTYPE),
    })
    return params


if __name__ == "__main__":
    key = jax.random.PRNGKey(0)
    kp, kt, kw = jax.random.split(key, 3)
    params = init_params(kw)

    # prompts: learned context embeddings, shape (n_prompts, seq, width)
    prompts = (0.02 * jax.random.normal(kp, (B, S, D))).astype(ACT_DTYPE)
    # tokenized_prompts: int tokens; argmax(-1) marks the EOT position
    tokens = jax.random.randint(kt, (B, S), 1, 100).astype(jnp.int32)
    eot_positions = jnp.array([5, 3], dtype=jnp.int32)
    tokens = tokens.at[jnp.arange(B), eot_positions].set(1000)

    out = jax.block_until_ready(text_encoder_forward(prompts, tokens, params))

    ref = reference_forward(prompts, tokens, params)
    assert out.shape == (B, E), out.shape
    # bf16 MXU operands (mixed precision, like CLIP's own fp16 tower) vs f32 reference.
    assert jnp.allclose(out, ref, atol=1e-2, rtol=1e-2), float(
        jnp.max(jnp.abs(out - ref)))

    print("KERNEL_OK")
</pallas_src>

<mosaic_0001>
module attributes {stable_mosaic.version = 11 : i64} {
  func.func @text_encoder_kernel(%arg0: i32, %arg1: memref<2xi32, #tpu.memory_space<smem>>, %arg2: memref<2x8x32xf32, #tpu.memory_space<vmem>>, %arg3: memref<8x32xf32, #tpu.memory_space<vmem>>, %arg4: memref<1x1x32xf32, #tpu.memory_space<vmem>>, %arg5: memref<1x1x32xf32, #tpu.memory_space<vmem>>, %arg6: memref<1x32x96xbf16, #tpu.memory_space<vmem>>, %arg7: memref<1x1x96xf32, #tpu.memory_space<vmem>>, %arg8: memref<1x32x32xbf16, #tpu.memory_space<vmem>>, %arg9: memref<1x1x32xf32, #tpu.memory_space<vmem>>, %arg10: memref<1x1x32xf32, #tpu.memory_space<vmem>>, %arg11: memref<1x1x32xf32, #tpu.memory_space<vmem>>, %arg12: memref<1x32x128xbf16, #tpu.memory_space<vmem>>, %arg13: memref<1x1x128xf32, #tpu.memory_space<vmem>>, %arg14: memref<1x128x32xbf16, #tpu.memory_space<vmem>>, %arg15: memref<1x1x32xf32, #tpu.memory_space<vmem>>, %arg16: memref<1x32xf32, #tpu.memory_space<vmem>>, %arg17: memref<1x32xf32, #tpu.memory_space<vmem>>, %arg18: memref<32x128xbf16, #tpu.memory_space<vmem>>, %arg19: memref<2x128xf32, #tpu.memory_space<vmem>>, %arg20: memref<16x32xf32, #tpu.memory_space<vmem>>, %arg21: memref<16x32xf32, #tpu.memory_space<vmem>>) attributes {dimension_semantics = [#tpu.dimension_semantics<arbitrary>], iteration_bounds = array<i64: 2>, scalar_prefetch = 1 : i64, scratch_operands = 2 : i64, tpu.core_type = #tpu.core_type<tc>, window_params = [{pipeline_mode = #tpu.pipeline_mode<synchronous>, transform_indices = @transform_0, window_bounds = array<i64: 2, 8, 32>}, {pipeline_mode = #tpu.pipeline_mode<synchronous>, transform_indices = @transform_1, window_bounds = array<i64: 8, 32>}, {transform_indices = @transform_2, window_bounds = array<i64: 1, 1, 32>}, {transform_indices = @transform_3, window_bounds = array<i64: 1, 1, 32>}, {transform_indices = @transform_4, window_bounds = array<i64: 1, 32, 96>}, {transform_indices = @transform_5, window_bounds = array<i64: 1, 1, 96>}, {transform_indices = @transform_6, window_bounds = array<i64: 1, 32, 32>}, {transform_indices = @transform_7, window_bounds = array<i64: 1, 1, 32>}, {transform_indices = @transform_8, window_bounds = array<i64: 1, 1, 32>}, {transform_indices = @transform_9, window_bounds = array<i64: 1, 1, 32>}, {transform_indices = @transform_10, window_bounds = array<i64: 1, 32, 128>}, {transform_indices = @transform_11, window_bounds = array<i64: 1, 1, 128>}, {transform_indices = @transform_12, window_bounds = array<i64: 1, 128, 32>}, {transform_indices = @transform_13, window_bounds = array<i64: 1, 1, 32>}, {pipeline_mode = #tpu.pipeline_mode<synchronous>, transform_indices = @transform_14, window_bounds = array<i64: 1, 32>}, {pipeline_mode = #tpu.pipeline_mode<synchronous>, transform_indices = @transform_15, window_bounds = array<i64: 1, 32>}, {pipeline_mode = #tpu.pipeline_mode<synchronous>, transform_indices = @transform_16, window_bounds = array<i64: 32, 128>}, {pipeline_mode = #tpu.pipeline_mode<synchronous>, transform_indices = @transform_17, window_bounds = array<i64: 2, 128>}]} {
    %c0_i32 = arith.constant 0 : i32
    %0 = arith.cmpi eq, %arg0, %c0_i32 : i32
    %1 = arith.extui %0 : i1 to i32
    %c0_i32_0 = arith.constant 0 : i32
    %2 = arith.cmpi ne, %1, %c0_i32_0 : i32
    scf.if %2 {
      %c0_107 = arith.constant 0 : index
      %c0_108 = arith.constant 0 : index
      %c0_109 = arith.constant 0 : index
      %295 = vector.load %arg2[%c0_107, %c0_108, %c0_109] : memref<2x8x32xf32, #tpu.memory_space<vmem>>, vector<2x8x32xf32>
      %c0_110 = arith.constant 0 : index
      %c0_111 = arith.constant 0 : index
      %296 = vector.load %arg3[%c0_110, %c0_111] : memref<8x32xf32, #tpu.memory_space<vmem>>, vector<8x32xf32>
      %297 = vector.shape_cast %296 : vector<8x32xf32> to vector<1x8x32xf32>
      %298 = vector.broadcast %297 : vector<1x8x32xf32> to vector<2x8x32xf32>
      %299 = arith.addf %295, %298 : vector<2x8x32xf32>
      %300 = vector.shape_cast %299 : vector<2x8x32xf32> to vector<16x32xf32>
      %c0_112 = arith.constant 0 : index
      %c0_113 = arith.constant 0 : index
      %301 = vector.load %arg20[%c0_112, %c0_113] : memref<16x32xf32, #tpu.memory_space<vmem>>, vector<16x32xf32>
      tpu.vector_store %arg20[%c0_112, %c0_113], %300 {strides = array<i32>} : memref<16x32xf32, #tpu.memory_space<vmem>>, vector<16x32xf32>,
    } else {
    }
    %3 = tpu.iota {dimensions = array<i32: 0>} : vector<8x8xi32>
    %4 = tpu.iota {dimensions = array<i32: 1>} : vector<8x8xi32>
    %5 = arith.cmpi sgt, %4, %3 : vector<8x8xi32>
    %cst = arith.constant -1.000000e+30 : f32
    %cst_1 = arith.constant 0.000000e+00 : f32
    %6 = vector.broadcast %cst : f32 to vector<8x8xf32>
    %7 = vector.broadcast %cst_1 : f32 to vector<8x8xf32>
    %8 = arith.select %5, %6, %7 : vector<8x8xi1>, vector<8x8xf32>
    %c0 = arith.constant 0 : index
    %c0_2 = arith.constant 0 : index
    %9 = vector.load %arg20[%c0, %c0_2] : memref<16x32xf32, #tpu.memory_space<vmem>>, vector<16x32xf32>
    %c0_3 = arith.constant 0 : index
    %c0_4 = arith.constant 0 : index
    %c0_5 = arith.constant 0 : index
    %10 = vector.load %arg4[%c0_3, %c0_4, %c0_5] : memref<1x1x32xf32, #tpu.memory_space<vmem>>, vector<1x1x32xf32>
    %11 = vector.shape_cast %10 : vector<1x1x32xf32> to vector<1x32xf32>
    %c0_6 = arith.constant 0 : index
    %c0_7 = arith.constant 0 : index
    %c0_8 = arith.constant 0 : index
    %12 = vector.load %arg5[%c0_6, %c0_7, %c0_8] : memref<1x1x32xf32, #tpu.memory_space<vmem>>, vector<1x1x32xf32>
    %13 = vector.shape_cast %12 : vector<1x1x32xf32> to vector<1x32xf32>
    %cst_9 = arith.constant dense<0.000000e+00> : vector<16xf32>
    %14 = vector.multi_reduction <add>, %9, %cst_9 [1] : vector<16x32xf32> to vector<16xf32>
    %15 = vector.shape_cast %14 : vector<16xf32> to vector<16x1xf32>
    %cst_10 = arith.constant 3.200000e+01 : f32
    %16 = vector.broadcast %cst_10 : f32 to vector<16x1xf32>
    %17 = arith.divf %15, %16 : vector<16x1xf32>
    %18 = vector.broadcast %17 : vector<16x1xf32> to vector<16x32xf32>
    %19 = arith.subf %9, %18 : vector<16x32xf32>
    %20 = arith.mulf %19, %19 : vector<16x32xf32>
    %cst_11 = arith.constant dense<0.000000e+00> : vector<16xf32>
    %21 = vector.multi_reduction <add>, %20, %cst_11 [1] : vector<16x32xf32> to vector<16xf32>
    %22 = vector.shape_cast %21 : vector<16xf32> to vector<16x1xf32>
    %cst_12 = arith.constant 3.200000e+01 : f32
    %23 = vector.broadcast %cst_12 : f32 to vector<16x1xf32>
    %24 = arith.divf %22, %23 : vector<16x1xf32>
    %25 = vector.broadcast %17 : vector<16x1xf32> to vector<16x32xf32>
    %26 = arith.subf %9, %25 : vector<16x32xf32>
    %cst_13 = arith.constant 9.99999974E-6 : f32
    %27 = vector.broadcast %cst_13 : f32 to vector<16x1xf32>
    %28 = arith.addf %24, %27 : vector<16x1xf32>
    %29 = math.rsqrt %28 : vector<16x1xf32>
    %30 = vector.broadcast %29 : vector<16x1xf32> to vector<16x32xf32>
    %31 = arith.mulf %26, %30 : vector<16x32xf32>
    %32 = vector.broadcast %11 : vector<1x32xf32> to vector<16x32xf32>
    %33 = arith.mulf %31, %32 : vector<16x32xf32>
    %34 = vector.broadcast %13 : vector<1x32xf32> to vector<16x32xf32>
    %35 = arith.addf %33, %34 : vector<16x32xf32>
    %36 = arith.truncf %35 : vector<16x32xf32> to vector<16x32xbf16>
    %c0_14 = arith.constant 0 : index
    %c0_15 = arith.constant 0 : index
    %c0_16 = arith.constant 0 : index
    %37 = vector.load %arg6[%c0_14, %c0_15, %c0_16] : memref<1x32x96xbf16, #tpu.memory_space<vmem>>, vector<1x32x96xbf16>
    %38 = vector.shape_cast %37 : vector<1x32x96xbf16> to vector<32x96xbf16>
    %cst_17 = arith.constant dense<0.000000e+00> : vector<16x96xf32>
    %39 = tpu.matmul %36, %38, %cst_17 {dimension_numbers = #tpu.dot_dimension_numbers<[1], [0], [0], [1], [0, 0, 1, 1], [], []>} : vector<16x32xbf16>, vector<32x96xbf16>, vector<16x96xf32> -> vector<16x96xf32>
    %c0_18 = arith.constant 0 : index
    %c0_19 = arith.constant 0 : index
    %c0_20 = arith.constant 0 : index
    %40 = vector.load %arg7[%c0_18, %c0_19, %c0_20] : memref<1x1x96xf32, #tpu.memory_space<vmem>>, vector<1x1x96xf32>
    %41 = vector.shape_cast %40 : vector<1x1x96xf32> to vector<1x96xf32>
    %42 = vector.broadcast %41 : vector<1x96xf32> to vector<16x96xf32>
    %43 = arith.addf %39, %42 : vector<16x96xf32>
    %44 = vector.extract_strided_slice %43 {offsets = [0, 0], sizes = [8, 32], strides = [1, 1]} : vector<16x96xf32> to vector<8x32xf32>
    %cst_21 = arith.constant 0.353553385 : f32
    %45 = vector.broadcast %cst_21 : f32 to vector<8x32xf32>
    %46 = arith.mulf %44, %45 : vector<8x32xf32>
    %47 = vector.extract_strided_slice %43 {offsets = [0, 32], sizes = [8, 32], strides = [1, 1]} : vector<16x96xf32> to vector<8x32xf32>
    %48 = vector.extract_strided_slice %43 {offsets = [0, 64], sizes = [8, 32], strides = [1, 1]} : vector<16x96xf32> to vector<8x32xf32>
    %49 = vector.extract_strided_slice %46 {offsets = [0, 0], sizes = [8, 8], strides = [1, 1]} : vector<8x32xf32> to vector<8x8xf32>
    %50 = arith.truncf %49 : vector<8x8xf32> to vector<8x8xbf16>
    %51 = vector.extract_strided_slice %47 {offsets = [0, 0], sizes = [8, 8], strides = [1, 1]} : vector<8x32xf32> to vector<8x8xf32>
    %52 = arith.truncf %51 : vector<8x8xf32> to vector<8x8xbf16>
    %53 = tpu.transpose %52, [1, 0] : vector<8x8xbf16> -> vector<8x8xbf16>
    %cst_22 = arith.constant dense<0.000000e+00> : vector<8x8xf32>
    %54 = tpu.matmul %50, %53, %cst_22 {dimension_numbers = #tpu.dot_dimension_numbers<[1], [0], [0], [1], [0, 0, 1, 1], [], []>} : vector<8x8xbf16>, vector<8x8xbf16>, vector<8x8xf32> -> vector<8x8xf32>
    %55 = arith.addf %54, %8 : vector<8x8xf32>
    %cst_23 = arith.constant dense<0xFF800000> : vector<8xf32>
    %56 = vector.multi_reduction <maximumf>, %55, %cst_23 [1] : vector<8x8xf32> to vector<8xf32>
    %57 = vector.shape_cast %56 : vector<8xf32> to vector<8x1xf32>
    %58 = vector.broadcast %57 : vector<8x1xf32> to vector<8x8xf32>
    %59 = arith.subf %55, %58 : vector<8x8xf32>
    %60 = math.exp %59 : vector<8x8xf32>
    %cst_24 = arith.constant dense<0.000000e+00> : vector<8xf32>
    %61 = vector.multi_reduction <add>, %60, %cst_24 [1] : vector<8x8xf32> to vector<8xf32>
    %62 = vector.shape_cast %61 : vector<8xf32> to vector<8x1xf32>
    %63 = tpu.reciprocal %62 {approx = true} : vector<8x1xf32> -> vector<8x1xf32>
    %64 = vector.broadcast %63 : vector<8x1xf32> to vector<8x8xf32>
    %65 = arith.mulf %60, %64 : vector<8x8xf32>
    %66 = arith.truncf %65 : vector<8x8xf32> to vector<8x8xbf16>
    %67 = vector.extract_strided_slice %48 {offsets = [0, 0], sizes = [8, 8], strides = [1, 1]} : vector<8x32xf32> to vector<8x8xf32>
    %68 = arith.truncf %67 : vector<8x8xf32> to vector<8x8xbf16>
    %cst_25 = arith.constant dense<0.000000e+00> : vector<8x8xf32>
    %69 = tpu.matmul %66, %68, %cst_25 {dimension_numbers = #tpu.dot_dimension_numbers<[1], [0], [0], [1], [0, 0, 1, 1], [], []>} : vector<8x8xbf16>, vector<8x8xbf16>, vector<8x8xf32> -> vector<8x8xf32>
    %c0_26 = arith.constant 0 : index
    %c0_27 = arith.constant 0 : index
    %70 = vector.load %arg21[%c0_26, %c0_27] : memref<16x32xf32, #tpu.memory_space<vmem>>, vector<8x8xf32>
    tpu.vector_store %arg21[%c0_26, %c0_27], %69 {strides = array<i32>} : memref<16x32xf32, #tpu.memory_space<vmem>>, vector<8x8xf32>,
    %71 = vector.extract_strided_slice %46 {offsets = [0, 8], sizes = [8, 8], strides = [1, 1]} : vector<8x32xf32> to vector<8x8xf32>
    %72 = arith.truncf %71 : vector<8x8xf32> to vector<8x8xbf16>
    %73 = vector.extract_strided_slice %47 {offsets = [0, 8], sizes = [8, 8], strides = [1, 1]} : vector<8x32xf32> to vector<8x8xf32>
    %74 = arith.truncf %73 : vector<8x8xf32> to vector<8x8xbf16>
    %75 = tpu.transpose %74, [1, 0] : vector<8x8xbf16> -> vector<8x8xbf16>
    %cst_28 = arith.constant dense<0.000000e+00> : vector<8x8xf32>
    %76 = tpu.matmul %72, %75, %cst_28 {dimension_numbers = #tpu.dot_dimension_numbers<[1], [0], [0], [1], [0, 0, 1, 1], [], []>} : vector<8x8xbf16>, vector<8x8xbf16>, vector<8x8xf32> -> vector<8x8xf32>
    %77 = arith.addf %76, %8 : vector<8x8xf32>
    %cst_29 = arith.constant dense<0xFF800000> : vector<8xf32>
    %78 = vector.multi_reduction <maximumf>, %77, %cst_29 [1] : vector<8x8xf32> to vector<8xf32>
    %79 = vector.shape_cast %78 : vector<8xf32> to vector<8x1xf32>
    %80 = vector.broadcast %79 : vector<8x1xf32> to vector<8x8xf32>
    %81 = arith.subf %77, %80 : vector<8x8xf32>
    %82 = math.exp %81 : vector<8x8xf32>
    %cst_30 = arith.constant dense<0.000000e+00> : vector<8xf32>
    %83 = vector.multi_reduction <add>, %82, %cst_30 [1] : vector<8x8xf32> to vector<8xf32>
    %84 = vector.shape_cast %83 : vector<8xf32> to vector<8x1xf32>
    %85 = tpu.reciprocal %84 {approx = true} : vector<8x1xf32> -> vector<8x1xf32>
    %86 = vector.broadcast %85 : vector<8x1xf32> to vector<8x8xf32>
    %87 = arith.mulf %82, %86 : vector<8x8xf32>
    %88 = arith.truncf %87 : vector<8x8xf32> to vector<8x8xbf16>
    %89 = vector.extract_strided_slice %48 {offsets = [0, 8], sizes = [8, 8], strides = [1, 1]} : vector<8x32xf32> to vector<8x8xf32>
    %90 = arith.truncf %89 : vector<8x8xf32> to vector<8x8xbf16>
    %cst_31 = arith.constant dense<0.000000e+00> : vector<8x8xf32>
    %91 = tpu.matmul %88, %90, %cst_31 {dimension_numbers = #tpu.dot_dimension_numbers<[1], [0], [0], [1], [0, 0, 1, 1], [], []>} : vector<8x8xbf16>, vector<8x8xbf16>, vector<8x8xf32> -> vector<8x8xf32>
    %c0_32 = arith.constant 0 : index
    %c8 = arith.constant 8 : index
    %92 = vector.load %arg21[%c0_32, %c8] : memref<16x32xf32, #tpu.memory_space<vmem>>, vector<8x8xf32>
    tpu.vector_store %arg21[%c0_32, %c8], %91 {strides = array<i32>} : memref<16x32xf32, #tpu.memory_space<vmem>>, vector<8x8xf32>,
    %93 = vector.extract_strided_slice %46 {offsets = [0, 16], sizes = [8, 8], strides = [1, 1]} : vector<8x32xf32> to vector<8x8xf32>
    %94 = arith.truncf %93 : vector<8x8xf32> to vector<8x8xbf16>
    %95 = vector.extract_strided_slice %47 {offsets = [0, 16], sizes = [8, 8], strides = [1, 1]} : vector<8x32xf32> to vector<8x8xf32>
    %96 = arith.truncf %95 : vector<8x8xf32> to vector<8x8xbf16>
    %97 = tpu.transpose %96, [1, 0] : vector<8x8xbf16> -> vector<8x8xbf16>
    %cst_33 = arith.constant dense<0.000000e+00> : vector<8x8xf32>
    %98 = tpu.matmul %94, %97, %cst_33 {dimension_numbers = #tpu.dot_dimension_numbers<[1], [0], [0], [1], [0, 0, 1, 1], [], []>} : vector<8x8xbf16>, vector<8x8xbf16>, vector<8x8xf32> -> vector<8x8xf32>
    %99 = arith.addf %98, %8 : vector<8x8xf32>
    %cst_34 = arith.constant dense<0xFF800000> : vector<8xf32>
    %100 = vector.multi_reduction <maximumf>, %99, %cst_34 [1] : vector<8x8xf32> to vector<8xf32>
    %101 = vector.shape_cast %100 : vector<8xf32> to vector<8x1xf32>
    %102 = vector.broadcast %101 : vector<8x1xf32> to vector<8x8xf32>
    %103 = arith.subf %99, %102 : vector<8x8xf32>
    %104 = math.exp %103 : vector<8x8xf32>
    %cst_35 = arith.constant dense<0.000000e+00> : vector<8xf32>
    %105 = vector.multi_reduction <add>, %104, %cst_35 [1] : vector<8x8xf32> to vector<8xf32>
    %106 = vector.shape_cast %105 : vector<8xf32> to vector<8x1xf32>
    %107 = tpu.reciprocal %106 {approx = true} : vector<8x1xf32> -> vector<8x1xf32>
    %108 = vector.broadcast %107 : vector<8x1xf32> to vector<8x8xf32>
    %109 = arith.mulf %104, %108 : vector<8x8xf32>
    %110 = arith.truncf %109 : vector<8x8xf32> to vector<8x8xbf16>
    %111 = vector.extract_strided_slice %48 {offsets = [0, 16], sizes = [8, 8], strides = [1, 1]} : vector<8x32xf32> to vector<8x8xf32>
    %112 = arith.truncf %111 : vector<8x8xf32> to vector<8x8xbf16>
    %cst_36 = arith.constant dense<0.000000e+00> : vector<8x8xf32>
    %113 = tpu.matmul %110, %112, %cst_36 {dimension_numbers = #tpu.dot_dimension_numbers<[1], [0], [0], [1], [0, 0, 1, 1], [], []>} : vector<8x8xbf16>, vector<8x8xbf16>, vector<8x8xf32> -> vector<8x8xf32>
    %c0_37 = arith.constant 0 : index
    %c16 = arith.constant 16 : index
    %114 = vector.load %arg21[%c0_37, %c16] : memref<16x32xf32, #tpu.memory_space<vmem>>, vector<8x8xf32>
    tpu.vector_store %arg21[%c0_37, %c16], %113 {strides = array<i32>} : memref<16x32xf32, #tpu.memory_space<vmem>>, vector<8x8xf32>,
    %115 = vector.extract_strided_slice %46 {offsets = [0, 24], sizes = [8, 8], strides = [1, 1]} : vector<8x32xf32> to vector<8x8xf32>
    %116 = arith.truncf %115 : vector<8x8xf32> to vector<8x8xbf16>
    %117 = vector.extract_strided_slice %47 {offsets = [0, 24], sizes = [8, 8], strides = [1, 1]} : vector<8x32xf32> to vector<8x8xf32>
    %118 = arith.truncf %117 : vector<8x8xf32> to vector<8x8xbf16>
    %119 = tpu.transpose %118, [1, 0] : vector<8x8xbf16> -> vector<8x8xbf16>
    %cst_38 = arith.constant dense<0.000000e+00> : vector<8x8xf32>
    %120 = tpu.matmul %116, %119, %cst_38 {dimension_numbers = #tpu.dot_dimension_numbers<[1], [0], [0], [1], [0, 0, 1, 1], [], []>} : vector<8x8xbf16>, vector<8x8xbf16>, vector<8x8xf32> -> vector<8x8xf32>
    %121 = arith.addf %120, %8 : vector<8x8xf32>
    %cst_39 = arith.constant dense<0xFF800000> : vector<8xf32>
    %122 = vector.multi_reduction <maximumf>, %121, %cst_39 [1] : vector<8x8xf32> to vector<8xf32>
    %123 = vector.shape_cast %122 : vector<8xf32> to vector<8x1xf32>
    %124 = vector.broadcast %123 : vector<8x1xf32> to vector<8x8xf32>
    %125 = arith.subf %121, %124 : vector<8x8xf32>
    %126 = math.exp %125 : vector<8x8xf32>
    %cst_40 = arith.constant dense<0.000000e+00> : vector<8xf32>
    %127 = vector.multi_reduction <add>, %126, %cst_40 [1] : vector<8x8xf32> to vector<8xf32>
    %128 = vector.shape_cast %127 : vector<8xf32> to vector<8x1xf32>
    %129 = tpu.reciprocal %128 {approx = true} : vector<8x1xf32> -> vector<8x1xf32>
    %130 = vector.broadcast %129 : vector<8x1xf32> to vector<8x8xf32>
    %131 = arith.mulf %126, %130 : vector<8x8xf32>
    %132 = arith.truncf %131 : vector<8x8xf32> to vector<8x8xbf16>
    %133 = vector.extract_strided_slice %48 {offsets = [0, 24], sizes = [8, 8], strides = [1, 1]} : vector<8x32xf32> to vector<8x8xf32>
    %134 = arith.truncf %133 : vector<8x8xf32> to vector<8x8xbf16>
    %cst_41 = arith.constant dense<0.000000e+00> : vector<8x8xf32>
    %135 = tpu.matmul %132, %134, %cst_41 {dimension_numbers = #tpu.dot_dimension_numbers<[1], [0], [0], [1], [0, 0, 1, 1], [], []>} : vector<8x8xbf16>, vector<8x8xbf16>, vector<8x8xf32> -> vector<8x8xf32>
    %c0_42 = arith.constant 0 : index
    %c24 = arith.constant 24 : index
    %136 = vector.load %arg21[%c0_42, %c24] : memref<16x32xf32, #tpu.memory_space<vmem>>, vector<8x8xf32>
    tpu.vector_store %arg21[%c0_42, %c24], %135 {strides = array<i32>} : memref<16x32xf32, #tpu.memory_space<vmem>>, vector<8x8xf32>,
    %137 = vector.extract_strided_slice %43 {offsets = [8, 0], sizes = [8, 32], strides = [1, 1]} : vector<16x96xf32> to vector<8x32xf32>
    %cst_43 = arith.constant 0.353553385 : f32
    %138 = vector.broadcast %cst_43 : f32 to vector<8x32xf32>
    %139 = arith.mulf %137, %138 : vector<8x32xf32>
    %140 = vector.extract_strided_slice %43 {offsets = [8, 32], sizes = [8, 32], strides = [1, 1]} : vector<16x96xf32> to vector<8x32xf32>
    %141 = vector.extract_strided_slice %43 {offsets = [8, 64], sizes = [8, 32], strides = [1, 1]} : vector<16x96xf32> to vector<8x32xf32>
    %142 = vector.extract_strided_slice %139 {offsets = [0, 0], sizes = [8, 8], strides = [1, 1]} : vector<8x32xf32> to vector<8x8xf32>
    %143 = arith.truncf %142 : vector<8x8xf32> to vector<8x8xbf16>
    %144 = vector.extract_strided_slice %140 {offsets = [0, 0], sizes = [8, 8], strides = [1, 1]} : vector<8x32xf32> to vector<8x8xf32>
    %145 = arith.truncf %144 : vector<8x8xf32> to vector<8x8xbf16>
    %146 = tpu.transpose %145, [1, 0] : vector<8x8xbf16> -> vector<8x8xbf16>
    %cst_44 = arith.constant dense<0.000000e+00> : vector<8x8xf32>
    %147 = tpu.matmul %143, %146, %cst_44 {dimension_numbers = #tpu.dot_dimension_numbers<[1], [0], [0], [1], [0, 0, 1, 1], [], []>} : vector<8x8xbf16>, vector<8x8xbf16>, vector<8x8xf32> -> vector<8x8xf32>
    %148 = arith.addf %147, %8 : vector<8x8xf32>
    %cst_45 = arith.constant dense<0xFF800000> : vector<8xf32>
    %149 = vector.multi_reduction <maximumf>, %148, %cst_45 [1] : vector<8x8xf32> to vector<8xf32>
    %150 = vector.shape_cast %149 : vector<8xf32> to vector<8x1xf32>
    %151 = vector.broadcast %150 : vector<8x1xf32> to vector<8x8xf32>
    %152 = arith.subf %148, %151 : vector<8x8xf32>
    %153 = math.exp %152 : vector<8x8xf32>
    %cst_46 = arith.constant dense<0.000000e+00> : vector<8xf32>
    %154 = vector.multi_reduction <add>, %153, %cst_46 [1] : vector<8x8xf32> to vector<8xf32>
    %155 = vector.shape_cast %154 : vector<8xf32> to vector<8x1xf32>
    %156 = tpu.reciprocal %155 {approx = true} : vector<8x1xf32> -> vector<8x1xf32>
    %157 = vector.broadcast %156 : vector<8x1xf32> to vector<8x8xf32>
    %158 = arith.mulf %153, %157 : vector<8x8xf32>
    %159 = arith.truncf %158 : vector<8x8xf32> to vector<8x8xbf16>
    %160 = vector.extract_strided_slice %141 {offsets = [0, 0], sizes = [8, 8], strides = [1, 1]} : vector<8x32xf32> to vector<8x8xf32>
    %161 = arith.truncf %160 : vector<8x8xf32> to vector<8x8xbf16>
    %cst_47 = arith.constant dense<0.000000e+00> : vector<8x8xf32>
    %162 = tpu.matmul %159, %161, %cst_47 {dimension_numbers = #tpu.dot_dimension_numbers<[1], [0], [0], [1], [0, 0, 1, 1], [], []>} : vector<8x8xbf16>, vector<8x8xbf16>, vector<8x8xf32> -> vector<8x8xf32>
    %c8_48 = arith.constant 8 : index
    %c0_49 = arith.constant 0 : index
    %163 = vector.load %arg21[%c8_48, %c0_49] : memref<16x32xf32, #tpu.memory_space<vmem>>, vector<8x8xf32>
    tpu.vector_store %arg21[%c8_48, %c0_49], %162 {strides = array<i32>} : memref<16x32xf32, #tpu.memory_space<vmem>>, vector<8x8xf32>,
    %164 = vector.extract_strided_slice %139 {offsets = [0, 8], sizes = [8, 8], strides = [1, 1]} : vector<8x32xf32> to vector<8x8xf32>
    %165 = arith.truncf %164 : vector<8x8xf32> to vector<8x8xbf16>
    %166 = vector.extract_strided_slice %140 {offsets = [0, 8], sizes = [8, 8], strides = [1, 1]} : vector<8x32xf32> to vector<8x8xf32>
    %167 = arith.truncf %166 : vector<8x8xf32> to vector<8x8xbf16>
    %168 = tpu.transpose %167, [1, 0] : vector<8x8xbf16> -> vector<8x8xbf16>
    %cst_50 = arith.constant dense<0.000000e+00> : vector<8x8xf32>
    %169 = tpu.matmul %165, %168, %cst_50 {dimension_numbers = #tpu.dot_dimension_numbers<[1], [0], [0], [1], [0, 0, 1, 1], [], []>} : vector<8x8xbf16>, vector<8x8xbf16>, vector<8x8xf32> -> vector<8x8xf32>
    %170 = arith.addf %169, %8 : vector<8x8xf32>
    %cst_51 = arith.constant dense<0xFF800000> : vector<8xf32>
    %171 = vector.multi_reduction <maximumf>, %170, %cst_51 [1] : vector<8x8xf32> to vector<8xf32>
    %172 = vector.shape_cast %171 : vector<8xf32> to vector<8x1xf32>
    %173 = vector.broadcast %172 : vector<8x1xf32> to vector<8x8xf32>
    %174 = arith.subf %170, %173 : vector<8x8xf32>
    %175 = math.exp %174 : vector<8x8xf32>
    %cst_52 = arith.constant dense<0.000000e+00> : vector<8xf32>
    %176 = vector.multi_reduction <add>, %175, %cst_52 [1] : vector<8x8xf32> to vector<8xf32>
    %177 = vector.shape_cast %176 : vector<8xf32> to vector<8x1xf32>
    %178 = tpu.reciprocal %177 {approx = true} : vector<8x1xf32> -> vector<8x1xf32>
    %179 = vector.broadcast %178 : vector<8x1xf32> to vector<8x8xf32>
    %180 = arith.mulf %175, %179 : vector<8x8xf32>
    %181 = arith.truncf %180 : vector<8x8xf32> to vector<8x8xbf16>
    %182 = vector.extract_strided_slice %141 {offsets = [0, 8], sizes = [8, 8], strides = [1, 1]} : vector<8x32xf32> to vector<8x8xf32>
    %183 = arith.truncf %182 : vector<8x8xf32> to vector<8x8xbf16>
    %cst_53 = arith.constant dense<0.000000e+00> : vector<8x8xf32>
    %184 = tpu.matmul %181, %183, %cst_53 {dimension_numbers = #tpu.dot_dimension_numbers<[1], [0], [0], [1], [0, 0, 1, 1], [], []>} : vector<8x8xbf16>, vector<8x8xbf16>, vector<8x8xf32> -> vector<8x8xf32>
    %c8_54 = arith.constant 8 : index
    %c8_55 = arith.constant 8 : index
    %185 = vector.load %arg21[%c8_54, %c8_55] : memref<16x32xf32, #tpu.memory_space<vmem>>, vector<8x8xf32>
    tpu.vector_store %arg21[%c8_54, %c8_55], %184 {strides = array<i32>} : memref<16x32xf32, #tpu.memory_space<vmem>>, vector<8x8xf32>,
    %186 = vector.extract_strided_slice %139 {offsets = [0, 16], sizes = [8, 8], strides = [1, 1]} : vector<8x32xf32> to vector<8x8xf32>
    %187 = arith.truncf %186 : vector<8x8xf32> to vector<8x8xbf16>
    %188 = vector.extract_strided_slice %140 {offsets = [0, 16], sizes = [8, 8], strides = [1, 1]} : vector<8x32xf32> to vector<8x8xf32>
    %189 = arith.truncf %188 : vector<8x8xf32> to vector<8x8xbf16>
    %190 = tpu.transpose %189, [1, 0] : vector<8x8xbf16> -> vector<8x8xbf16>
    %cst_56 = arith.constant dense<0.000000e+00> : vector<8x8xf32>
    %191 = tpu.matmul %187, %190, %cst_56 {dimension_numbers = #tpu.dot_dimension_numbers<[1], [0], [0], [1], [0, 0, 1, 1], [], []>} : vector<8x8xbf16>, vector<8x8xbf16>, vector<8x8xf32> -> vector<8x8xf32>
    %192 = arith.addf %191, %8 : vector<8x8xf32>
    %cst_57 = arith.constant dense<0xFF800000> : vector<8xf32>
    %193 = vector.multi_reduction <maximumf>, %192, %cst_57 [1] : vector<8x8xf32> to vector<8xf32>
    %194 = vector.shape_cast %193 : vector<8xf32> to vector<8x1xf32>
    %195 = vector.broadcast %194 : vector<8x1xf32> to vector<8x8xf32>
    %196 = arith.subf %192, %195 : vector<8x8xf32>
    %197 = math.exp %196 : vector<8x8xf32>
    %cst_58 = arith.constant dense<0.000000e+00> : vector<8xf32>
    %198 = vector.multi_reduction <add>, %197, %cst_58 [1] : vector<8x8xf32> to vector<8xf32>
    %199 = vector.shape_cast %198 : vector<8xf32> to vector<8x1xf32>
    %200 = tpu.reciprocal %199 {approx = true} : vector<8x1xf32> -> vector<8x1xf32>
    %201 = vector.broadcast %200 : vector<8x1xf32> to vector<8x8xf32>
    %202 = arith.mulf %197, %201 : vector<8x8xf32>
    %203 = arith.truncf %202 : vector<8x8xf32> to vector<8x8xbf16>
    %204 = vector.extract_strided_slice %141 {offsets = [0, 16], sizes = [8, 8], strides = [1, 1]} : vector<8x32xf32> to vector<8x8xf32>
    %205 = arith.truncf %204 : vector<8x8xf32> to vector<8x8xbf16>
    %cst_59 = arith.constant dense<0.000000e+00> : vector<8x8xf32>
    %206 = tpu.matmul %203, %205, %cst_59 {dimension_numbers = #tpu.dot_dimension_numbers<[1], [0], [0], [1], [0, 0, 1, 1], [], []>} : vector<8x8xbf16>, vector<8x8xbf16>, vector<8x8xf32> -> vector<8x8xf32>
    %c8_60 = arith.constant 8 : index
    %c16_61 = arith.constant 16 : index
    %207 = vector.load %arg21[%c8_60, %c16_61] : memref<16x32xf32, #tpu.memory_space<vmem>>, vector<8x8xf32>
    tpu.vector_store %arg21[%c8_60, %c16_61], %206 {strides = array<i32>} : memref<16x32xf32, #tpu.memory_space<vmem>>, vector<8x8xf32>,
    %208 = vector.extract_strided_slice %139 {offsets = [0, 24], sizes = [8, 8], strides = [1, 1]} : vector<8x32xf32> to vector<8x8xf32>
    %209 = arith.truncf %208 : vector<8x8xf32> to vector<8x8xbf16>
    %210 = vector.extract_strided_slice %140 {offsets = [0, 24], sizes = [8, 8], strides = [1, 1]} : vector<8x32xf32> to vector<8x8xf32>
    %211 = arith.truncf %210 : vector<8x8xf32> to vector<8x8xbf16>
    %212 = tpu.transpose %211, [1, 0] : vector<8x8xbf16> -> vector<8x8xbf16>
    %cst_62 = arith.constant dense<0.000000e+00> : vector<8x8xf32>
    %213 = tpu.matmul %209, %212, %cst_62 {dimension_numbers = #tpu.dot_dimension_numbers<[1], [0], [0], [1], [0, 0, 1, 1], [], []>} : vector<8x8xbf16>, vector<8x8xbf16>, vector<8x8xf32> -> vector<8x8xf32>
    %214 = arith.addf %213, %8 : vector<8x8xf32>
    %cst_63 = arith.constant dense<0xFF800000> : vector<8xf32>
    %215 = vector.multi_reduction <maximumf>, %214, %cst_63 [1] : vector<8x8xf32> to vector<8xf32>
    %216 = vector.shape_cast %215 : vector<8xf32> to vector<8x1xf32>
    %217 = vector.broadcast %216 : vector<8x1xf32> to vector<8x8xf32>
    %218 = arith.subf %214, %217 : vector<8x8xf32>
    %219 = math.exp %218 : vector<8x8xf32>
    %cst_64 = arith.constant dense<0.000000e+00> : vector<8xf32>
    %220 = vector.multi_reduction <add>, %219, %cst_64 [1] : vector<8x8xf32> to vector<8xf32>
    %221 = vector.shape_cast %220 : vector<8xf32> to vector<8x1xf32>
    %222 = tpu.reciprocal %221 {approx = true} : vector<8x1xf32> -> vector<8x1xf32>
    %223 = vector.broadcast %222 : vector<8x1xf32> to vector<8x8xf32>
    %224 = arith.mulf %219, %223 : vector<8x8xf32>
    %225 = arith.truncf %224 : vector<8x8xf32> to vector<8x8xbf16>
    %226 = vector.extract_strided_slice %141 {offsets = [0, 24], sizes = [8, 8], strides = [1, 1]} : vector<8x32xf32> to vector<8x8xf32>
    %227 = arith.truncf %226 : vector<8x8xf32> to vector<8x8xbf16>
    %cst_65 = arith.constant dense<0.000000e+00> : vector<8x8xf32>
    %228 = tpu.matmul %225, %227, %cst_65 {dimension_numbers = #tpu.dot_dimension_numbers<[1], [0], [0], [1], [0, 0, 1, 1], [], []>} : vector<8x8xbf16>, vector<8x8xbf16>, vector<8x8xf32> -> vector<8x8xf32>
    %c8_66 = arith.constant 8 : index
    %c24_67 = arith.constant 24 : index
    %229 = vector.load %arg21[%c8_66, %c24_67] : memref<16x32xf32, #tpu.memory_space<vmem>>, vector<8x8xf32>
    tpu.vector_store %arg21[%c8_66, %c24_67], %228 {strides = array<i32>} : memref<16x32xf32, #tpu.memory_space<vmem>>, vector<8x8xf32>,
    %c0_68 = arith.constant 0 : index
    %c0_69 = arith.constant 0 : index
    %230 = vector.load %arg21[%c0_68, %c0_69] : memref<16x32xf32, #tpu.memory_space<vmem>>, vector<16x32xf32>
    %231 = arith.truncf %230 : vector<16x32xf32> to vector<16x32xbf16>
    %c0_70 = arith.constant 0 : index
    %c0_71 = arith.constant 0 : index
    %c0_72 = arith.constant 0 : index
    %232 = vector.load %arg8[%c0_70, %c0_71, %c0_72] : memref<1x32x32xbf16, #tpu.memory_space<vmem>>, vector<1x32x32xbf16>
    %233 = vector.shape_cast %232 : vector<1x32x32xbf16> to vector<32x32xbf16>
    %cst_73 = arith.constant dense<0.000000e+00> : vector<16x32xf32>
    %234 = tpu.matmul %231, %233, %cst_73 {dimension_numbers = #tpu.dot_dimension_numbers<[1], [0], [0], [1], [0, 0, 1, 1], [], []>} : vector<16x32xbf16>, vector<32x32xbf16>, vector<16x32xf32> -> vector<16x32xf32>
    %c0_74 = arith.constant 0 : index
    %c0_75 = arith.constant 0 : index
    %c0_76 = arith.constant 0 : index
    %235 = vector.load %arg9[%c0_74, %c0_75, %c0_76] : memref<1x1x32xf32, #tpu.memory_space<vmem>>, vector<1x1x32xf32>
    %236 = vector.shape_cast %235 : vector<1x1x32xf32> to vector<1x32xf32>
    %237 = vector.broadcast %236 : vector<1x32xf32> to vector<16x32xf32>
    %238 = arith.addf %234, %237 : vector<16x32xf32>
    %239 = arith.addf %9, %238 : vector<16x32xf32>
    %c0_77 = arith.constant 0 : index
    %c0_78 = arith.constant 0 : index
    %c0_79 = arith.constant 0 : index
    %240 = vector.load %arg10[%c0_77, %c0_78, %c0_79] : memref<1x1x32xf32, #tpu.memory_space<vmem>>, vector<1x1x32xf32>
    %241 = vector.shape_cast %240 : vector<1x1x32xf32> to vector<1x32xf32>
    %c0_80 = arith.constant 0 : index
    %c0_81 = arith.constant 0 : index
    %c0_82 = arith.constant 0 : index
    %242 = vector.load %arg11[%c0_80, %c0_81, %c0_82] : memref<1x1x32xf32, #tpu.memory_space<vmem>>, vector<1x1x32xf32>
    %243 = vector.shape_cast %242 : vector<1x1x32xf32> to vector<1x32xf32>
    %cst_83 = arith.constant dense<0.000000e+00> : vector<16xf32>
    %244 = vector.multi_reduction <add>, %239, %cst_83 [1] : vector<16x32xf32> to vector<16xf32>
    %245 = vector.shape_cast %244 : vector<16xf32> to vector<16x1xf32>
    %cst_84 = arith.constant 3.200000e+01 : f32
    %246 = vector.broadcast %cst_84 : f32 to vector<16x1xf32>
    %247 = arith.divf %245, %246 : vector<16x1xf32>
    %248 = vector.broadcast %247 : vector<16x1xf32> to vector<16x32xf32>
    %249 = arith.subf %239, %248 : vector<16x32xf32>
    %250 = arith.mulf %249, %249 : vector<16x32xf32>
    %cst_85 = arith.constant dense<0.000000e+00> : vector<16xf32>
    %251 = vector.multi_reduction <add>, %250, %cst_85 [1] : vector<16x32xf32> to vector<16xf32>
    %252 = vector.shape_cast %251 : vector<16xf32> to vector<16x1xf32>
    %cst_86 = arith.constant 3.200000e+01 : f32
    %253 = vector.broadcast %cst_86 : f32 to vector<16x1xf32>
    %254 = arith.divf %252, %253 : vector<16x1xf32>
    %255 = vector.broadcast %247 : vector<16x1xf32> to vector<16x32xf32>
    %256 = arith.subf %239, %255 : vector<16x32xf32>
    %cst_87 = arith.constant 9.99999974E-6 : f32
    %257 = vector.broadcast %cst_87 : f32 to vector<16x1xf32>
    %258 = arith.addf %254, %257 : vector<16x1xf32>
    %259 = math.rsqrt %258 : vector<16x1xf32>
    %260 = vector.broadcast %259 : vector<16x1xf32> to vector<16x32xf32>
    %261 = arith.mulf %256, %260 : vector<16x32xf32>
    %262 = vector.broadcast %241 : vector<1x32xf32> to vector<16x32xf32>
    %263 = arith.mulf %261, %262 : vector<16x32xf32>
    %264 = vector.broadcast %243 : vector<1x32xf32> to vector<16x32xf32>
    %265 = arith.addf %263, %264 : vector<16x32xf32>
    %266 = arith.truncf %265 : vector<16x32xf32> to vector<16x32xbf16>
    %c0_88 = arith.constant 0 : index
    %c0_89 = arith.constant 0 : index
    %c0_90 = arith.constant 0 : index
    %267 = vector.load %arg12[%c0_88, %c0_89, %c0_90] : memref<1x32x128xbf16, #tpu.memory_space<vmem>>, vector<1x32x128xbf16>
    %268 = vector.shape_cast %267 : vector<1x32x128xbf16> to vector<32x128xbf16>
    %cst_91 = arith.constant dense<0.000000e+00> : vector<16x128xf32>
    %269 = tpu.matmul %266, %268, %cst_91 {dimension_numbers = #tpu.dot_dimension_numbers<[1], [0], [0], [1], [0, 0, 1, 1], [], []>} : vector<16x32xbf16>, vector<32x128xbf16>, vector<16x128xf32> -> vector<16x128xf32>
    %c0_92 = arith.constant 0 : index
    %c0_93 = arith.constant 0 : index
    %c0_94 = arith.constant 0 : index
    %270 = vector.load %arg13[%c0_92, %c0_93, %c0_94] : memref<1x1x128xf32, #tpu.memory_space<vmem>>, vector<1x1x128xf32>
    %271 = vector.shape_cast %270 : vector<1x1x128xf32> to vector<1x128xf32>
    %272 = vector.broadcast %271 : vector<1x128xf32> to vector<16x128xf32>
    %273 = arith.addf %269, %272 : vector<16x128xf32>
    %cst_95 = arith.constant 1.702000e+00 : f32
    %274 = vector.broadcast %cst_95 : f32 to vector<16x128xf32>
    %275 = arith.mulf %274, %273 : vector<16x128xf32>
    %276 = arith.negf %275 : vector<16x128xf32>
    %277 = math.exp %276 : vector<16x128xf32>
    %cst_96 = arith.constant 1.000000e+00 : f32
    %278 = vector.broadcast %cst_96 : f32 to vector<16x128xf32>
    %279 = arith.addf %278, %277 : vector<16x128xf32>
    %280 = arith.divf %278, %279 : vector<16x128xf32>
    %281 = arith.mulf %273, %280 : vector<16x128xf32>
    %282 = arith.truncf %281 : vector<16x128xf32> to vector<16x128xbf16>
    %c0_97 = arith.constant 0 : index
    %c0_98 = arith.constant 0 : index
    %c0_99 = arith.constant 0 : index
    %283 = vector.load %arg14[%c0_97, %c0_98, %c0_99] : memref<1x128x32xbf16, #tpu.memory_space<vmem>>, vector<1x128x32xbf16>
    %284 = vector.shape_cast %283 : vector<1x128x32xbf16> to vector<128x32xbf16>
    %cst_100 = arith.constant dense<0.000000e+00> : vector<16x32xf32>
    %285 = tpu.matmul %282, %284, %cst_100 {dimension_numbers = #tpu.dot_dimension_numbers<[1], [0], [0], [1], [0, 0, 1, 1], [], []>} : vector<16x128xbf16>, vector<128x32xbf16>, vector<16x32xf32> -> vector<16x32xf32>
    %286 = arith.addf %239, %285 : vector<16x32xf32>
    %c0_101 = arith.constant 0 : index
    %c0_102 = arith.constant 0 : index
    %c0_103 = arith.constant 0 : index
    %287 = vector.load %arg15[%c0_101, %c0_102, %c0_103] : memref<1x1x32xf32, #tpu.memory_space<vmem>>, vector<1x1x32xf32>
    %288 = vector.shape_cast %287 : vector<1x1x32xf32> to vector<1x32xf32>
    %289 = vector.broadcast %288 : vector<1x32xf32> to vector<16x32xf32>
    %290 = arith.addf %286, %289 : vector<16x32xf32>
    %c0_104 = arith.constant 0 : index
    %c0_105 = arith.constant 0 : index
    %291 = vector.load %arg20[%c0_104, %c0_105] : memref<16x32xf32, #tpu.memory_space<vmem>>, vector<16x32xf32>
    tpu.vector_store %arg20[%c0_104, %c0_105], %290 {strides = array<i32>} : memref<16x32xf32, #tpu.memory_space<vmem>>, vector<16x32xf32>,
    %c1_i32 = arith.constant 1 : i32
    %292 = arith.cmpi eq, %arg0, %c1_i32 : i32
    %293 = arith.extui %292 : i1 to i32
    %c0_i32_106 = arith.constant 0 : i32
    %294 = arith.cmpi ne, %293, %c0_i32_106 : i32
    scf.if %294 {
      %c0_107 = arith.constant 0 : index
      %295 = memref.load %arg1[%c0_107] : memref<2xi32, #tpu.memory_space<smem>>
      %296 = arith.index_cast %295 : i32 to index
      %c0_108 = arith.constant 0 : index
      %297 = vector.load %arg20[%296, %c0_108] : memref<16x32xf32, #tpu.memory_space<vmem>>, vector<1x32xf32>
      %c1 = arith.constant 1 : index
      %298 = memref.load %arg1[%c1] : memref<2xi32, #tpu.memory_space<smem>>
      %299 = arith.index_cast %298 : i32 to index
      %c0_109 = arith.constant 0 : index
      %300 = vector.load %arg20[%299, %c0_109] : memref<16x32xf32, #tpu.memory_space<vmem>>, vector<1x32xf32>
      %301 = tpu.concatenate %297, %300 in 0 : vector<1x32xf32>, vector<1x32xf32> -> vector<2x32xf32>
      %c0_110 = arith.constant 0 : index
      %c0_111 = arith.constant 0 : index
      %302 = vector.load %arg16[%c0_110, %c0_111] : memref<1x32xf32, #tpu.memory_space<vmem>>, vector<1x32xf32>
      %c0_112 = arith.constant 0 : index
      %c0_113 = arith.constant 0 : index
      %303 = vector.load %arg17[%c0_112, %c0_113] : memref<1x32xf32, #tpu.memory_space<vmem>>, vector<1x32xf32>
      %cst_114 = arith.constant dense<0.000000e+00> : vector<2xf32>
      %304 = vector.multi_reduction <add>, %301, %cst_114 [1] : vector<2x32xf32> to vector<2xf32>
      %305 = vector.shape_cast %304 : vector<2xf32> to vector<2x1xf32>
      %cst_115 = arith.constant 3.200000e+01 : f32
      %306 = vector.broadcast %cst_115 : f32 to vector<2x1xf32>
      %307 = arith.divf %305, %306 : vector<2x1xf32>
      %308 = vector.broadcast %307 : vector<2x1xf32> to vector<2x32xf32>
      %309 = arith.subf %301, %308 : vector<2x32xf32>
      %310 = arith.mulf %309, %309 : vector<2x32xf32>
      %cst_116 = arith.constant dense<0.000000e+00> : vector<2xf32>
      %311 = vector.multi_reduction <add>, %310, %cst_116 [1] : vector<2x32xf32> to vector<2xf32>
      %312 = vector.shape_cast %311 : vector<2xf32> to vector<2x1xf32>
      %cst_117 = arith.constant 3.200000e+01 : f32
      %313 = vector.broadcast %cst_117 : f32 to vector<2x1xf32>
      %314 = arith.divf %312, %313 : vector<2x1xf32>
      %315 = vector.broadcast %307 : vector<2x1xf32> to vector<2x32xf32>
      %316 = arith.subf %301, %315 : vector<2x32xf32>
      %cst_118 = arith.constant 9.99999974E-6 : f32
      %317 = vector.broadcast %cst_118 : f32 to vector<2x1xf32>
      %318 = arith.addf %314, %317 : vector<2x1xf32>
      %319 = math.rsqrt %318 : vector<2x1xf32>
      %320 = vector.broadcast %319 : vector<2x1xf32> to vector<2x32xf32>
      %321 = arith.mulf %316, %320 : vector<2x32xf32>
      %322 = vector.broadcast %302 : vector<1x32xf32> to vector<2x32xf32>
      %323 = arith.mulf %321, %322 : vector<2x32xf32>
      %324 = vector.broadcast %303 : vector<1x32xf32> to vector<2x32xf32>
      %325 = arith.addf %323, %324 : vector<2x32xf32>
      %326 = arith.truncf %325 : vector<2x32xf32> to vector<2x32xbf16>
      %c0_119 = arith.constant 0 : index
      %c0_120 = arith.constant 0 : index
      %327 = vector.load %arg18[%c0_119, %c0_120] : memref<32x128xbf16, #tpu.memory_space<vmem>>, vector<32x128xbf16>
      %cst_121 = arith.constant dense<0.000000e+00> : vector<2x128xf32>
      %328 = tpu.matmul %326, %327, %cst_121 {dimension_numbers = #tpu.dot_dimension_numbers<[1], [0], [0], [1], [0, 0, 1, 1], [], []>} : vector<2x32xbf16>, vector<32x128xbf16>, vector<2x128xf32> -> vector<2x128xf32>
      %c0_122 = arith.constant 0 : index
      %c0_123 = arith.constant 0 : index
      %329 = vector.load %arg19[%c0_122, %c0_123] : memref<2x128xf32, #tpu.memory_space<vmem>>, vector<2x128xf32>
      tpu.vector_store %arg19[%c0_122, %c0_123], %328 {strides = array<i32>} : memref<2x128xf32, #tpu.memory_space<vmem>>, vector<2x128xf32>,
    } else {
    }
    return
  }
  func.func @transform_0(%arg0: i32, %arg1: memref<2xi32, #tpu.memory_space<smem>>) -> (i32, i32, i32) {
    %c0_i32 = arith.constant 0 : i32
    %c0_i32_0 = arith.constant 0 : i32
    %c0_i32_1 = arith.constant 0 : i32
    %c0_i32_2 = arith.constant 0 : i32
    return %c0_i32, %c0_i32_0, %c0_i32_1 : i32, i32, i32
  }
  func.func @transform_1(%arg0: i32, %arg1: memref<2xi32, #tpu.memory_space<smem>>) -> (i32, i32) {
    %c0_i32 = arith.constant 0 : i32
    %c0_i32_0 = arith.constant 0 : i32
    %c0_i32_1 = arith.constant 0 : i32
    return %c0_i32, %c0_i32_0 : i32, i32
  }
  func.func @transform_2(%arg0: i32, %arg1: memref<2xi32, #tpu.memory_space<smem>>) -> (i32, i32, i32) {
    %c0_i32 = arith.constant 0 : i32
    %c0_i32_0 = arith.constant 0 : i32
    %c0_i32_1 = arith.constant 0 : i32
    return %arg0, %c0_i32, %c0_i32_0 : i32, i32, i32
  }
  func.func @transform_3(%arg0: i32, %arg1: memref<2xi32, #tpu.memory_space<smem>>) -> (i32, i32, i32) {
    %c0_i32 = arith.constant 0 : i32
    %c0_i32_0 = arith.constant 0 : i32
    %c0_i32_1 = arith.constant 0 : i32
    return %arg0, %c0_i32, %c0_i32_0 : i32, i32, i32
  }
  func.func @transform_4(%arg0: i32, %arg1: memref<2xi32, #tpu.memory_space<smem>>) -> (i32, i32, i32) {
    %c0_i32 = arith.constant 0 : i32
    %c0_i32_0 = arith.constant 0 : i32
    %c0_i32_1 = arith.constant 0 : i32
    return %arg0, %c0_i32, %c0_i32_0 : i32, i32, i32
  }
  func.func @transform_5(%arg0: i32, %arg1: memref<2xi32, #tpu.memory_space<smem>>) -> (i32, i32, i32) {
    %c0_i32 = arith.constant 0 : i32
    %c0_i32_0 = arith.constant 0 : i32
    %c0_i32_1 = arith.constant 0 : i32
    return %arg0, %c0_i32, %c0_i32_0 : i32, i32, i32
  }
  func.func @transform_6(%arg0: i32, %arg1: memref<2xi32, #tpu.memory_space<smem>>) -> (i32, i32, i32) {
    %c0_i32 = arith.constant 0 : i32
    %c0_i32_0 = arith.constant 0 : i32
    %c0_i32_1 = arith.constant 0 : i32
    return %arg0, %c0_i32, %c0_i32_0 : i32, i32, i32
  }
  func.func @transform_7(%arg0: i32, %arg1: memref<2xi32, #tpu.memory_space<smem>>) -> (i32, i32, i32) {
    %c0_i32 = arith.constant 0 : i32
    %c0_i32_0 = arith.constant 0 : i32
    %c0_i32_1 = arith.constant 0 : i32
    return %arg0, %c0_i32, %c0_i32_0 : i32, i32, i32
  }
  func.func @transform_8(%arg0: i32, %arg1: memref<2xi32, #tpu.memory_space<smem>>) -> (i32, i32, i32) {
    %c0_i32 = arith.constant 0 : i32
    %c0_i32_0 = arith.constant 0 : i32
    %c0_i32_1 = arith.constant 0 : i32
    return %arg0, %c0_i32, %c0_i32_0 : i32, i32, i32
  }
  func.func @transform_9(%arg0: i32, %arg1: memref<2xi32, #tpu.memory_space<smem>>) -> (i32, i32, i32) {
    %c0_i32 = arith.constant 0 : i32
    %c0_i32_0 = arith.constant 0 : i32
    %c0_i32_1 = arith.constant 0 : i32
    return %arg0, %c0_i32, %c0_i32_0 : i32, i32, i32
  }
  func.func @transform_10(%arg0: i32, %arg1: memref<2xi32, #tpu.memory_space<smem>>) -> (i32, i32, i32) {
    %c0_i32 = arith.constant 0 : i32
    %c0_i32_0 = arith.constant 0 : i32
    %c0_i32_1 = arith.constant 0 : i32
    return %arg0, %c0_i32, %c0_i32_0 : i32, i32, i32
  }
  func.func @transform_11(%arg0: i32, %arg1: memref<2xi32, #tpu.memory_space<smem>>) -> (i32, i32, i32) {
    %c0_i32 = arith.constant 0 : i32
    %c0_i32_0 = arith.constant 0 : i32
    %c0_i32_1 = arith.constant 0 : i32
    return %arg0, %c0_i32, %c0_i32_0 : i32, i32, i32
  }
  func.func @transform_12(%arg0: i32, %arg1: memref<2xi32, #tpu.memory_space<smem>>) -> (i32, i32, i32) {
    %c0_i32 = arith.constant 0 : i32
    %c0_i32_0 = arith.constant 0 : i32
    %c0_i32_1 = arith.constant 0 : i32
    return %arg0, %c0_i32, %c0_i32_0 : i32, i32, i32
  }
  func.func @transform_13(%arg0: i32, %arg1: memref<2xi32, #tpu.memory_space<smem>>) -> (i32, i32, i32) {
    %c0_i32 = arith.constant 0 : i32
    %c0_i32_0 = arith.constant 0 : i32
    %c0_i32_1 = arith.constant 0 : i32
    return %arg0, %c0_i32, %c0_i32_0 : i32, i32, i32
  }
  func.func @transform_14(%arg0: i32, %arg1: memref<2xi32, #tpu.memory_space<smem>>) -> (i32, i32) {
    %c0_i32 = arith.constant 0 : i32
    %c0_i32_0 = arith.constant 0 : i32
    %c0_i32_1 = arith.constant 0 : i32
    return %c0_i32, %c0_i32_0 : i32, i32
  }
  func.func @transform_15(%arg0: i32, %arg1: memref<2xi32, #tpu.memory_space<smem>>) -> (i32, i32) {
    %c0_i32 = arith.constant 0 : i32
    %c0_i32_0 = arith.constant 0 : i32
    %c0_i32_1 = arith.constant 0 : i32
    return %c0_i32, %c0_i32_0 : i32, i32
  }
  func.func @transform_16(%arg0: i32, %arg1: memref<2xi32, #tpu.memory_space<smem>>) -> (i32, i32) {
    %c0_i32 = arith.constant 0 : i32
    %c0_i32_0 = arith.constant 0 : i32
    %c0_i32_1 = arith.constant 0 : i32
    return %c0_i32, %c0_i32_0 : i32, i32
  }
  func.func @transform_17(%arg0: i32, %arg1: memref<2xi32, #tpu.memory_space<smem>>) -> (i32, i32) {
    %c0_i32 = arith.constant 0 : i32
    %c0_i32_0 = arith.constant 0 : i32
    %c0_i32_1 = arith.constant 0 : i32
    return %c0_i32, %c0_i32_0 : i32, i32
  }
}

</mosaic_0001>

<bundles_post_ra>
// kernel: tpu_custom_call.1
= control target key start
LH: loop header
LB: loop body
LE: loop exit
PB: predicated region body
PF: predicated region fallthrough
CT: control target
= control target key end

     0   :  { %s2110_s30 = smov [#allocation5]   ;;  %s2530_s0 = inlined_call_operand.vmem [shape: s32[2], index: 0, kind: input, shape index: {}]   ;;  %s2531_s1 = inlined_call_operand.vmem [shape: f32[2,8,32], index: 1, kind: input, shape index: {}]   ;;  %s2532_s2 = inlined_call_operand.vmem [shape: f32[8,32], index: 2, kind: input, shape index: {}]   ;;  %s2533_s3 = inlined_call_operand.vmem [shape: f32[2,1,32], index: 3, kind: input, shape index: {}]   ;;  %s2534_s4 = inlined_call_operand.vmem [shape: f32[2,1,32], index: 4, kind: input, shape index: {}]   ;;  %s2535_s5 = inlined_call_operand.vmem [shape: bf16[2,32,96], index: 5, kind: input, shape index: {}]   ;;  %s2536_s6 = inlined_call_operand.vmem [shape: f32[2,1,96], index: 6, kind: input, shape index: {}]   ;;  %s2537_s7 = inlined_call_operand.vmem [shape: bf16[2,32,32], index: 7, kind: input, shape index: {}]   ;;  %s2538_s8 = inlined_call_operand.vmem [shape: f32[2,1,32], index: 8, kind: input, shape index: {}]   ;;  %s2539_s9 = inlined_call_operand.vmem [shape: f32[2,1,32], index: 9, kind: input, shape index: {}]   ;;  %s2540_s10 = inlined_call_operand.vmem [shape: f32[2,1,32], index: 10, kind: input, shape index: {}]   ;;  %s2541_s11 = inlined_call_operand.vmem [shape: bf16[2,32,128], index: 11, kind: input, shape index: {}]   ;;  %s2542_s12 = inlined_call_operand.vmem [shape: f32[2,1,128], index: 12, kind: input, shape index: {}]   ;;  %s2543_s13 = inlined_call_operand.vmem [shape: bf16[2,128,32], index: 13, kind: input, shape index: {}]   ;;  %s2544_s14 = inlined_call_operand.vmem [shape: f32[2,1,32], index: 14, kind: input, shape index: {}]   ;;  %s2545_s15 = inlined_call_operand.vmem [shape: f32[1,32], index: 15, kind: input, shape index: {}]   ;;  %s2546_s16 = inlined_call_operand.vmem [shape: f32[1,32], index: 16, kind: input, shape index: {}]   ;;  %s2547_s17 = inlined_call_operand.vmem [shape: bf16[32,128], index: 17, kind: input, shape index: {}]   ;;  %s2548_s18 = inlined_call_operand.hbm [shape: f32[2,128], index: 18, kind: output, shape index: {}]  }
   0x1   :  { %2552 = sst [smem:[#allocation11_spill]] %s2530_s0 }
   0x2   :  { %2553 = sst [smem:[#allocation12_spill]] %s2531_s1 }
   0x3   :  { %2554 = sst [smem:[#allocation13_spill]] %s2532_s2 }
   0x4   :  { %2555 = sst [smem:[#allocation14_spill]] %s2535_s5 }
   0x5   :  { %2556 = sst [smem:[#allocation15_spill]] %s2537_s7 }
   0x6   :  { %2557 = sst [smem:[#allocation16_spill]] %s2542_s12 }
   0x7   :  { %2558 = sst [smem:[#allocation17_spill]] %s2545_s15 }
   0x8   :  { %2559 = sst [smem:[#allocation18_spill]] %s2546_s16 }
   0x9   :  { %2560 = sst [smem:[#allocation19_spill]] %s2547_s17 }
   0xa   :  { %2561 = sst [smem:[#allocation20_spill]] %s2548_s18 }
   0xb   :  { %s2562_s29 = sld [smem:[#allocation11_spill]] }
  0x11   :  { %s24_s12 = sshll.u32 %s2562_s29, 4  ;;  %s25_s12 = int_to_ptr.vmem [resolvable:$true] %s24_s12 }
  0x12   :  { %27 = dma.vmem_to_smem %s25_s12, 16, %s2110_s30, [#allocation4] }
  0x13   :  { %2100 = dma.done.wait [#allocation4], 16 }
  0x14   :  { %2101 = vsyncadd [#allocation4], 4294967280 }
  0x15   :  { %30 = sfence }
  0x16   :  { %31 = vsyncpa [#allocation7], 0  ;;  %s2226_s0 = smov 0  }
  0x17 LB: > { %2563 = sst [smem:[#allocation10_spill]] %s2108_s0  ;;  %s2232_s19 = sadd.s32 4294967295, %s2108_s0   ;;  %s2108_s0 = sphi %s2226_s0, %s37_s0  }
  0x18   : > { %p1840_p0 = scmp.ge.s32.totalorder %s2108_s0, 1  ;;  %p586_p1 = scmp.lt.s32.totalorder %s2108_s0, 3 }
  0x1a   : > { %p587_p2 = pnand %p1840_p0, %p586_p1 }
  0x1b   : > { %p672_p3 = scmp.lt.s32.totalorder (!%p587_p2), %s2232_s19, 1  ;;  %s2564_s5 = sld [smem:[#allocation14_spill]] (!%p587_p2) }
  0x1c   : > { %590 = sbr.rel (%p587_p2) target bundleno = 2832 (0xb10), region = 88  ;;  %s2565_s7 = sld [smem:[#allocation15_spill]] (!%p587_p2) }
  0x1d   : > { %p1849_p4 = scmp.ne.s32.totalorder (!%p587_p2), %s2232_s19, 0 }
  0x21   : > { %s2238_s12 = scalar_select %p672_p3, %s2232_s19, 1 }
  0x22   : > { %s2567_s28 = sld [smem:[#allocation12_spill]] (!%p1849_p4) }
  0x23   : > { %s1942_s24 = sshll.u32 %s2238_s12, 4  ;;  %s696_s16 = scalar_lea.vmem %s2539_s9, %s2238_s12 }
  0x24   : > { %s2256_s30 = scalar_lea.vmem %s2564_s5, %s1942_s24  ;;  %s2261_s0 = scalar_lea.vmem %s2565_s7, %s1942_s24 }
  0x25   : > { %s699_s27 = scalar_lea.vmem %s2540_s10, %s2238_s12  ;;  %s2278_s5 = scalar_lea.vmem %s2541_s11, %s1942_s24 }
  0x26   : > { %s2566_s7 = sld [smem:[#allocation16_spill]]  ;;  %s1945_s17 = sshll.u32 %s2238_s12, 6 }
  0x27   : > { %s2288_s22 = scalar_lea.vmem %s2543_s13, %s1945_s17  ;;  %s715_s25 = scalar_lea.vmem %s2544_s14, %s2238_s12 }
  0x28   : > { %720 = sbr.rel (%p1849_p4) target bundleno = 55 (0x37), region = 92 }
  0x2c   : > { %s707_s15 = scalar_lea.vmem %s2566_s7, %s2238_s12  ;;  %s2568_s7 = sld [smem:[#allocation13_spill]] (!%p1849_p4) }
  0x2d   : > { %v721_v0 = vld [vmem:[%s2567_s28] sm:$0xff]  ;;  %vm726_vm0 = vcmask 261120   ;;  %v722_v2 = vld [vmem:[%s2567_s28 + $0x8] sm:$0xff] }
  0x32   : > { %v723_v1 = vld [vmem:[%s2568_s7] sm:$0xff] }
  0x33   : > { %v724_v3 = vadd.f32 %v723_v1, %v721_v0  ;;  %v725_v4 = vadd.f32 %v723_v1, %v722_v2 }
  0x35   : > { %727 = vst.msk [vmem:[#allocation2] sm:$0xff] %vm726_vm0, %v724_v3 }
  0x36   : > { %728 = vst.msk [vmem:[#allocation2 + $0x8] sm:$0xff] %vm726_vm0, %v725_v4 }
  0x37 PF: > { %vm739_vm1 = vcmask 261120   ;;  %v2111_v9 = vmov 32.0   ;;  %v1947_v26 = vld [vmem:[%s2256_s30 + $0x8] sm:$0xff]  ;;  %v1946_v28 = vld [vmem:[%s2256_s30] sm:$0xff]  ;;  %s2569_s21 = scalar_lea.vmem %s2533_s3, %s2238_s12  ;;  %s2570_s26 = scalar_lea.vmem %s2534_s4, %s2238_s12  ;;  %vm845_vm9 = vcmask 64512   ;;  %vm882_vm10 = vcmask 1043456  }
  0x38   : > { %2002 = vrcp.f32 %v2111_v9  ;;  %831 = vmatpush.bf16.msra.mxu0 %v1947_v26  ;;  %v1994_v47 = vld [vmem:[%s2569_s21] ss:$0 sm:$0xff]  ;;  %s2571_s1 = scalar_lea.vmem %s2536_s6, %s2238_s12  ;;  %s2112_s7 = smov 88   ;;  %vm961_vm12 = vcmask 130112   ;;  %vm1023_vm13 = vcmask 195712   ;;  %vm1085_vm14 = vcmask 261312  }
  0x39   : > { %v1995_v52 = vld [vmem:[%s2570_s26] ss:$0 sm:$0xff]  ;;  %s2113_s20 = smov 64   ;;  %s2114_s18 = smov 96  }
  0x3a   : > { %v1996_v57 = vld [vmem:[%s2571_s1] ss:$0 sm:$0xff]  ;;  %s2115_s17 = smov 120   ;;  %s2116_s30 = smov 104  }
  0x3b   : > { %s2117_s21 = smov 112   ;;  %s2119_s23 = smov 80  }
  0x3c   : > { %v2304_v5 = vld [vmem:[#allocation2] sm:$0xff]  ;;  %832 = vmatpush.bf16.msra.mxu0 %v1946_v28  ;;  %s2120_s2 = smov 72   ;;  %s2121_s26 = smov 48  }
  0x3d   : > { %v740_v6 = vsel %vm739_vm1, %v2304_v5, 0.0  ;;  %v2308_v7 = vld [vmem:[#allocation2 + $0x8] sm:$0xff]  ;;  %s2122_s24 = smov 56   ;;  %s2123_s29 = smov 40  }
  0x3e   : > { %741 = vadd.xlane.f32.xlu0 %v740_v6  ;;  %v743_v8 = vsel %vm739_vm1, %v2308_v7, 0.0  ;;  %v2003_v10 = vpop.eup %2002  ;;  %s2124_s1 = smov 8   ;;  %p1927_p5 = scmp.ne.s32.totalorder %s2232_s19, 1 }
  0x3f   : > { %v747_v11 = vmul.f32 32.0, %v2003_v10  ;;  %vm751_vm2 = vweird.f32 %v2003_v10 }
  0x41   : > { %v748_v12 = vsub.f32 1.0, %v747_v11 }
  0x43   : > { %v749_v13 = vmul.f32 %v2003_v10, %v748_v12  ;;  %v729_v12 = vlaneseq }
  0x45   : > { %v750_v14 = vadd.f32 %v2003_v10, %v749_v13  ;;  %v730_v13 = vshrl.u32 %v729_v12, 7 }
  0x46   : > { %744 = vadd.xlane.f32.xlu0 %v743_v8 }
  0x47   : > { %v2312_v15 = vsel %vm751_vm2, %v2003_v10, %v750_v14  ;;  %v732_v14 = vand.u32 127, %v729_v12 }
  0x49   : > { %vm733_vm11 = vcmp.gt.s32.totalorder %v732_v14, %v730_v13 }
  0xb1   : > { %v742_v16 = vpop.xlane.xlu0 %741 }
  0xb2   : > { %v753_v17 = vmul.f32 %v2312_v15, %v742_v16  ;;  %v2118_v16 = vmov 0.0  }
  0xb4   : > { %v755_v18 = vsub.f32 %v2304_v5, %v753_v17  ;;  %v2356_v17 = vsel %vm733_vm11, -1e+30, %v2118_v16 }
  0xb6   : > { %v757_v19 = vmul.f32 %v755_v18, %v755_v18 }
  0xb8   : > { %v759_v20 = vsel %vm739_vm1, %v757_v19, 0.0 }
  0xb9   : > { %760 = vadd.xlane.f32.xlu1 %v759_v20  ;;  %v745_v21 = vpop.xlane.xlu0 %744 }
  0xba   : > { %v754_v22 = vmul.f32 %v2312_v15, %v745_v21 }
  0xbc   : > { %v756_v23 = vsub.f32 %v2308_v7, %v754_v22 }
  0xbe   : > { %v758_v24 = vmul.f32 %v756_v23, %v756_v23 }
  0xc0   : > { %v762_v25 = vsel %vm739_vm1, %v758_v24, 0.0 }
  0xc1   : > { %763 = vadd.xlane.f32.xlu1 %v762_v25 }
 0x12c   : > { %v761_v27 = vpop.xlane.xlu1 %760 }
 0x12d   : > { %v765_v29 = vmul.f32 %v761_v27, %v2312_v15 }
 0x12f   : > { %v767_v30 = vadd.f32 1e-05, %v765_v29 }
 0x131   : > { %2004 = vrsqrt.f32 %v767_v30  ;;  %vm775_vm4 = vweird.f32 %v767_v30 }
 0x134   : > { %v764_v31 = vpop.xlane.xlu1 %763 }
 0x135   : > { %v766_v32 = vmul.f32 %v764_v31, %v2312_v15 }
 0x137   : > { %v2005_v33 = vpop.eup %2004  ;;  %v768_v34 = vadd.f32 1e-05, %v766_v32 }
 0x138   : > { %v770_v35 = vmul.f32 %v2005_v33, %v767_v30  ;;  %vm776_vm3 = vweird.f32 %v2005_v33 }
 0x139   : > { %2006 = vrsqrt.f32 %v768_v34  ;;  %vm777_vm5 = vmor %vm775_vm4, %vm776_vm3  ;;  %vm785_vm7 = vweird.f32 %v768_v34 }
 0x13a   : > { %v771_v36 = vmul.f32 %v2005_v33, %v770_v35 }
 0x13c   : > { %v772_v37 = vmul.f32 0.5, %v771_v36 }
 0x13e   : > { %v773_v38 = vsub.f32 1.5, %v772_v37 }
 0x13f   : > { %v2007_v39 = vpop.eup %2006 }
 0x140   : > { %v774_v40 = vmul.f32 %v2005_v33, %v773_v38  ;;  %v780_v41 = vmul.f32 %v2007_v39, %v768_v34  ;;  %vm786_vm6 = vweird.f32 %v2007_v39 }
 0x141   : > { %vm787_vm8 = vmor %vm785_vm7, %vm786_vm6 }
 0x142   : > { %v781_v42 = vmul.f32 %v2007_v39, %v780_v41  ;;  %v778_v43 = vsel %vm777_vm5, %v2005_v33, %v774_v40 }
 0x143   : > { %v789_v46 = vmul.f32 %v778_v43, %v755_v18 }
 0x144   : > { %v782_v44 = vmul.f32 0.5, %v781_v42 }
 0x145   : > { %v794_v51 = vmul.f32 %v1994_v47, %v789_v46 }
 0x146   : > { %v783_v45 = vsub.f32 1.5, %v782_v44 }
 0x147   : > { %v799_v54 = vadd.f32 %v1995_v52, %v794_v51 }
 0x148   : > { %v784_v48 = vmul.f32 %v2007_v39, %v783_v45 }
 0x14a   : > { %v788_v49 = vsel %vm787_vm8, %v2007_v39, %v784_v48 }
 0x14b   : > { %v790_v50 = vmul.f32 %v788_v49, %v756_v23 }
 0x14d   : > { %v795_v53 = vmul.f32 %v1994_v47, %v790_v50 }
 0x14f   : > { %v800_v55 = vadd.f32 %v1995_v52, %v795_v53 }
 0x151   : > { %v801_v56 = vpack.c.bf16 %v800_v55, %v799_v54 }
 0x153   : > { %1858 = vmatmul.msk.bf16.vlgmr.msra.gmra.mxu0 %vm739_vm1, %v801_v56 }
 0x1d0   : > { %v834_v58 = vpop.f32.mrf.mxu0 }
 0x1d1   : > { %v835_v59 = vadd.f32 %v1996_v57, %v834_v58 }
 0x1d3   : > { %v2340_v60 = vpack.c.bf16 %v835_v59, %v835_v59  ;;  %v839_v61 = vmul.f32 0.35355338, %v835_v59 }
 0x1d5   : > { %903 = vrot.lane.b32.xlu0 %v2340_v60, %s2112_s7  ;;  %877 = vrot.lane.b32.xlu1 %v2340_v60, %s2113_s20  ;;  %v840_v62 = vpack.c.bf16 %v839_v61, %v839_v61 }
 0x1d6   : > { %843 = vrot.lane.b32.xlu2 %v2340_v60, %s2114_s18 }
 0x1d8   : > { %v836_v63 = vpop.f32.mrf.mxu0 }
 0x1d9   : > { %v837_v0 = vadd.f32 %v1996_v57, %v836_v63 }
 0x1db   : > { %v2349_v1 = vpack.c.bf16 %v837_v0, %v837_v0  ;;  %v1087_v2 = vmul.f32 0.35355338, %v837_v0 }
 0x1dd   : > { %901 = vrot.lane.b32.xlu1 %v840_v62, %s2115_s17  ;;  %v1088_v3 = vpack.c.bf16 %v1087_v2, %v1087_v2 }
 0x1e5   : > { %1025 = vrot.lane.b32.xlu1 %v840_v62, %s2116_s30 }
 0x1ed   : > { %963 = vrot.lane.b32.xlu1 %v840_v62, %s2117_s21 }
 0x1f5   : > { %1091 = vrot.lane.b32.xlu1 %v2349_v1, %s2114_s18 }
 0x1fd   : > { %1269 = vrot.lane.b32.xlu1 %v1088_v3, %s2116_s30  ;;  %s2572_s30 = scalar_lea.vmem %s2538_s8, %s2238_s12 }
 0x230   : > { %v844_v4 = vpop.permute.xlu2 %843 }
 0x231   : > { %v850_v6 = vsel %vm845_vm9, %v844_v4, 0 }
 0x232   : > { %859 = vmatpush.bf16.xpose.msra.mxu1 %v850_v6 }
 0x239   : > { %1859 = vmatmul.msk.bf16.vlgmr.msra.gmra.mxu1 %vm845_vm9, %v840_v62 }
 0x247   : > { %v904_v8 = vpop.permute.xlu0 %903  ;;  %v878_v9 = vpop.permute.xlu1 %877 }
 0x248   : > { %v884_v10 = vsel %vm882_vm10, %v878_v9, 0  ;;  %v909_v11 = vsel %vm845_vm9, %v904_v8, 0 }
 0x249   : > { %893 = vmatpush.bf16.msra.mxu2 %v884_v10 }
 0x24d   : > { %918 = vmatpush.bf16.xpose.msrb.mxu2 %v909_v11 }
 0x24f   : > { %v902_v22 = vpop.permute.xlu1 %901 }
 0x257   : > { %v1026_v23 = vpop.permute.xlu1 %1025 }
 0x25f   : > { %v964_v24 = vpop.permute.xlu1 %963 }
 0x267   : > { %v1092_v28 = vpop.permute.xlu1 %1091 }
 0x268   : > { %v1097_v31 = vsel %vm845_vm9, %v1092_v28, 0 }
 0x26f   : > { %v1270_v54 = vpop.permute.xlu1 %1269 }
 0x2b6   : > { %v861_v18 = vpop.f32.mrf.mxu1 }
 0x2b7   : > { %v862_v19 = vadd.f32 %v861_v18, %v2356_v17 }
 0x2b9   : > { %v865_v20 = vsel %vm845_vm9, %v862_v19, -inf }
 0x2ba   : > { %866 = vmax.xlane.f32.xlu2 %v865_v20 }
 0x2be   : > { %v863_v21 = vpop.f32.mrf.mxu1 }
 0x2d2   : > { %965 = vrot.lane.b32.xlu2 %v2340_v60, %s2119_s23 }
 0x2da   : > { %1210 = vrot.lane.b32.xlu2 %v2349_v1, %s2119_s23  ;;  %s2576_s23 = sld [smem:[#allocation18_spill]] (!%p1927_p5) }
 0x32d   : > { %v867_v25 = vpop.xlane.xlu2 %866 }
 0x32e   : > { %v868_v26 = vsub.f32 %v862_v19, %v867_v25 }
 0x330   : > { %v869_v27 = vmul.f32 1.442695, %v868_v26 }
 0x332   : > { %2008 = vpow2.f32 %v869_v27 }
 0x335   : > { %v966_v29 = vpop.permute.xlu2 %965 }
 0x336   : > { %v971_v30 = vsel %vm845_vm9, %v966_v29, 0 }
 0x337   : > { %980 = vmatpush.bf16.xpose.msrb.mxu0 %v971_v30 }
 0x338   : > { %v2009_v32 = vpop.eup %2008 }
 0x339   : > { %v871_v33 = vsel %vm845_vm9, %v2009_v32, 0.0 }
 0x33a   : > { %872 = vadd.xlane.f32.xlu0 %v871_v33 }
 0x33d   : > { %v1211_v34 = vpop.permute.xlu2 %1210 }
 0x33e   : > { %v1216_v35 = vsel %vm845_vm9, %v1211_v34, 0  ;;  %1863 = vmatmul.msk.bf16.vlgmr.msrb.gmra.mxu0 %vm845_vm9, %v964_v24 }
 0x33f   : > { %1106 = vmatpush.bf16.xpose.msra.mxu0 %v1097_v31 }
 0x347   : > { %1225 = vmatpush.bf16.xpose.msrb.mxu0 %v1216_v35 }
 0x34e   : > { %1027 = vrot.lane.b32.xlu0 %v2340_v60, %s2120_s2  ;;  %1867 = vmatmul.msk.bf16.vlgmr.msra.gmra.mxu0 %vm845_vm9, %v1088_v3 }
 0x356   : > { %1149 = vrot.lane.b32.xlu0 %v2349_v1, %s2112_s7  ;;  %s2125_s7 = smov 16  }
 0x35e   : > { %1147 = vrot.lane.b32.xlu0 %v1088_v3, %s2115_s17 }
 0x366   : > { %1271 = vrot.lane.b32.xlu0 %v2349_v1, %s2120_s2 }
 0x36e   : > { %1208 = vrot.lane.b32.xlu0 %v1088_v3, %s2117_s21 }
 0x3ad   : > { %v873_v36 = vpop.xlane.xlu0 %872 }
 0x3ae   : > { %2010 = vrcp.f32 %v873_v36 }
 0x3b4   : > { %v2011_v37 = vpop.eup %2010 }
 0x3b5   : > { %v875_v38 = vmul.f32 %v2011_v37, %v2009_v32 }
 0x3b7   : > { %v876_v39 = vpack.c.bf16 %v875_v38, %v875_v38 }
 0x3b9   : > { %1860 = vmatmul.msk.bf16.vlgmr.msra.gmra.mxu2 %vm845_vm9, %v876_v39 }
 0x3bb   : > { %v982_v40 = vpop.f32.mrf.mxu0 }
 0x3bc   : > { %v983_v41 = vadd.f32 %v982_v40, %v2356_v17 }
 0x3be   : > { %v986_v42 = vsel %vm845_vm9, %v983_v41, -inf }
 0x3bf   : > { %987 = vmax.xlane.f32.xlu0 %v986_v42 }
 0x3c0   : > { %v1028_v43 = vpop.permute.xlu0 %1027 }
 0x3c1   : > { %v1033_v44 = vsel %vm845_vm9, %v1028_v43, 0 }
 0x3c2   : > { %1042 = vmatpush.bf16.xpose.msra.mxu3 %v1033_v44 }
 0x3c3   : > { %v984_v45 = vpop.f32.mrf.mxu0 }
 0x3c8   : > { %v1150_v46 = vpop.permute.xlu0 %1149 }
 0x3c9   : > { %1861 = vmatmul.msk.bf16.vlgmr.msrb.gmra.mxu2 %vm845_vm9, %v902_v22  ;;  %1865 = vmatmul.msk.bf16.vlgmr.msra.gmra.mxu3 %vm845_vm9, %v1026_v23  ;;  %v1155_v47 = vsel %vm845_vm9, %v1150_v46, 0 }
 0x3ca   : > { %1164 = vmatpush.bf16.xpose.msrb.mxu3 %v1155_v47 }
 0x3cb   : > { %v1108_v48 = vpop.f32.mrf.mxu0 }
 0x3cc   : > { %v2391_v0 = vadd.f32 %v1108_v48, %v2356_v17 }
 0x3ce   : > { %v1112_v6 = vsel %vm845_vm9, %v2391_v0, -inf }
 0x3d0   : > { %v1148_v49 = vpop.permute.xlu0 %1147 }
 0x3d3   : > { %v1110_v50 = vpop.f32.mrf.mxu0 }
 0x3d8   : > { %v1272_v51 = vpop.permute.xlu0 %1271 }
 0x3d9   : > { %v1277_v52 = vsel %vm845_vm9, %v1272_v51, 0  ;;  %1869 = vmatmul.msk.bf16.vlgmr.msrb.gmra.mxu3 %vm845_vm9, %v1148_v49 }
 0x3da   : > { %1286 = vmatpush.bf16.xpose.msra.mxu3 %v1277_v52 }
 0x3e0   : > { %v1209_v53 = vpop.permute.xlu0 %1208 }
 0x3e1   : > { %1871 = vmatmul.msk.bf16.vlgmr.msrb.gmra.mxu0 %vm845_vm9, %v1209_v53 }
 0x3e9   : > { %1873 = vmatmul.msk.bf16.vlgmr.msra.gmra.mxu3 %vm845_vm9, %v1270_v54 }
 0x432   : > { %v988_v4 = vpop.xlane.xlu0 %987 }
 0x433   : > { %v989_v8 = vsub.f32 %v983_v41, %v988_v4 }
 0x435   : > { %v990_v9 = vmul.f32 1.442695, %v989_v8 }
 0x437   : > { %2012 = vpow2.f32 %v990_v9 }
 0x43c   : > { %v895_v55 = vpop.f32.mrf.mxu2 }
 0x43d   : > { %899 = vst.msk [vmem:[#allocation3] sm:$0xff] %vm845_vm9, %v895_v55  ;;  %v2013_v19 = vpop.eup %2012 }
 0x43e   : > { %v992_v21 = vsel %vm845_vm9, %v2013_v19, 0.0 }
 0x444   : > { %v897_v56 = vpop.f32.mrf.mxu2 }
 0x44c   : > { %v920_v57 = vpop.f32.mrf.mxu2  ;;  %v1044_v58 = vpop.f32.mrf.mxu3 }
 0x44d   : > { %v921_v59 = vadd.f32 %v920_v57, %v2356_v17  ;;  %v1045_v61 = vadd.f32 %v1044_v58, %v2356_v17 }
 0x44f   : > { %v924_v62 = vsel %vm845_vm9, %v921_v59, -inf  ;;  %v1048_v63 = vsel %vm845_vm9, %v1045_v61, -inf }
 0x450   : > { %925 = vmax.xlane.f32.xlu1 %v924_v62  ;;  %1049 = vmax.xlane.f32.xlu2 %v1048_v63 }
 0x454   : > { %v922_v2 = vpop.f32.mrf.mxu2  ;;  %v1046_v3 = vpop.f32.mrf.mxu3 }
 0x458   : > { %1113 = vmax.xlane.f32.xlu1 %v1112_v6 }
 0x45c   : > { %v1166_v10 = vpop.f32.mrf.mxu3 }
 0x45d   : > { %v1167_v11 = vadd.f32 %v1166_v10, %v2356_v17 }
 0x45e   : > { %v1227_v12 = vpop.f32.mrf.mxu0 }
 0x45f   : > { %v1228_v13 = vadd.f32 %v1227_v12, %v2356_v17  ;;  %v1170_v14 = vsel %vm845_vm9, %v1167_v11, -inf }
 0x460   : > { %1171 = vmax.xlane.f32.xlu2 %v1170_v14 }
 0x461   : > { %v1231_v16 = vsel %vm845_vm9, %v1228_v13, -inf }
 0x462   : > { %1232 = vmax.xlane.f32.xlu1 %v1231_v16 }
 0x464   : > { %v1168_v18 = vpop.f32.mrf.mxu3 }
 0x466   : > { %v1229_v20 = vpop.f32.mrf.mxu0 }
 0x46a   : > { %993 = vadd.xlane.f32.xlu1 %v992_v21 }
 0x46c   : > { %v1288_v22 = vpop.f32.mrf.mxu3 }
 0x46d   : > { %v1289_v23 = vadd.f32 %v1288_v22, %v2356_v17 }
 0x46f   : > { %v1292_v24 = vsel %vm845_vm9, %v1289_v23, -inf }
 0x470   : > { %1293 = vmax.xlane.f32.xlu0 %v1292_v24 }
 0x474   : > { %v1290_v25 = vpop.f32.mrf.mxu3 }
 0x483   : > { %998 = vrot.lane.b32.xlu1 %v2340_v60, %s2121_s26 }
 0x484   : > { %936 = vrot.lane.b32.xlu0 %v2340_v60, %s2122_s24 }
 0x48b   : > { %1182 = vrot.lane.b32.xlu1 %v2349_v1, %s2122_s24  ;;  %s1928_s24 = sld [smem:[#allocation5 + $0x1]] (!%p1927_p5) }
 0x491   : > { %s1605_s12 = scalar_lea.vmem (!%p1927_p5), [#allocation2], %s1928_s24 }
 0x493   : > { %1124 = vrot.lane.b32.xlu1 %v2349_v1, %s2113_s20  ;;  %s2126_s20 = smov 24  }
 0x4c3   : > { %v926_v26 = vpop.xlane.xlu1 %925  ;;  %v1050_v27 = vpop.xlane.xlu2 %1049 }
 0x4c4   : > { %v1051_v28 = vsub.f32 %v1045_v61, %v1050_v27  ;;  %v927_v29 = vsub.f32 %v921_v59, %v926_v26 }
 0x4c6   : > { %v1052_v17 = vmul.f32 1.442695, %v1051_v28  ;;  %v928_v30 = vmul.f32 1.442695, %v927_v29 }
 0x4c8   : > { %2014 = vpow2.f32 %v1052_v17 }
 0x4c9   : > { %2016 = vpow2.f32 %v928_v30 }
 0x4cb   : > { %v1114_v31 = vpop.xlane.xlu1 %1113 }
 0x4ce   : > { %v2408_v32 = vpop.eup %2014 }
 0x4cf   : > { %v1054_v33 = vsel %vm845_vm9, %v2408_v32, 0.0  ;;  %v2017_v36 = vpop.eup %2016 }
 0x4d0   : > { %1055 = vadd.xlane.f32.xlu2 %v1054_v33  ;;  %v930_v40 = vsel %vm845_vm9, %v2017_v36, 0.0 }
 0x4d3   : > { %v1172_v34 = vpop.xlane.xlu2 %1171 }
 0x4d4   : > { %v1173_v35 = vsub.f32 %v1167_v11, %v1172_v34 }
 0x4d5   : > { %v1233_v37 = vpop.xlane.xlu1 %1232 }
 0x4d6   : > { %v1174_v38 = vmul.f32 1.442695, %v1173_v35  ;;  %v1234_v39 = vsub.f32 %v1228_v13, %v1233_v37 }
 0x4d8   : > { %2018 = vpow2.f32 %v1174_v38  ;;  %931 = vadd.xlane.f32.xlu2 %v930_v40  ;;  %v1235_v41 = vmul.f32 1.442695, %v1234_v39 }
 0x4da   : > { %2020 = vpow2.f32 %v1235_v41 }
 0x4dd   : > { %v994_v49 = vpop.xlane.xlu1 %993 }
 0x4de   : > { %v2413_v42 = vpop.eup %2018 }
 0x4df   : > { %v1176_v43 = vsel %vm845_vm9, %v2413_v42, 0.0 }
 0x4e0   : > { %1177 = vadd.xlane.f32.xlu0 %v1176_v43  ;;  %v2417_v45 = vpop.eup %2020 }
 0x4e1   : > { %v1237_v48 = vsel %vm845_vm9, %v2417_v45, 0.0 }
 0x4e3   : > { %v1294_v44 = vpop.xlane.xlu0 %1293 }
 0x4e4   : > { %v1295_v46 = vsub.f32 %v1289_v23, %v1294_v44 }
 0x4e6   : > { %v1296_v47 = vmul.f32 1.442695, %v1295_v46 }
 0x4e8   : > { %2022 = vpow2.f32 %v1296_v47  ;;  %1238 = vadd.xlane.f32.xlu0 %v1237_v48 }
 0x4e9   : > { %2024 = vrcp.f32 %v994_v49 }
 0x4ee   : > { %v2023_v50 = vpop.eup %2022 }
 0x4ef   : > { %v1298_v51 = vsel %vm845_vm9, %v2023_v50, 0.0  ;;  %v2025_v52 = vpop.eup %2024 }
 0x4f0   : > { %1299 = vadd.xlane.f32.xlu1 %v1298_v51  ;;  %1060 = vrot.lane.b32.xlu2 %v2340_v60, %s2123_s29  ;;  %v996_v53 = vmul.f32 %v2025_v52, %v2013_v19  ;;  %v1115_v60 = vsub.f32 %v2391_v0, %v1114_v31 }
 0x4f2   : > { %v997_v58 = vpack.c.bf16 %v996_v53, %v996_v53  ;;  %v1116_v63 = vmul.f32 1.442695, %v1115_v60  ;;  %v1949_v53 = vld [vmem:[%s2261_s0 + $0x8] sm:$0xff] }
 0x4f3   : > { %1362 = vmatpush.bf16.msra.mxu0 %v1949_v53  ;;  %v1955_v53 = vld [vmem:[%s2288_s22 + $0x18] sm:$0xff] }
 0x4f4   : > { %2026 = vpow2.f32 %v1116_v63 }
 0x4f5   : > { %v999_v54 = vpop.permute.xlu1 %998 }
 0x4f6   : > { %v937_v55 = vpop.permute.xlu0 %936  ;;  %v1004_v56 = vsel %vm882_vm10, %v999_v54, 0  ;;  %v1948_v54 = vld [vmem:[%s2261_s0] sm:$0xff] }
 0x4f7   : > { %v942_v57 = vsel %vm882_vm10, %v937_v55, 0  ;;  %1013 = vmatpush.bf16.msrb.mxu1 %v1004_v56  ;;  %1363 = vmatpush.bf16.msra.mxu0 %v1948_v54 }
 0x4f8   : > { %951 = vmatpush.bf16.msra.mxu2 %v942_v57 }
 0x4fa   : > { %1864 = vmatmul.msk.bf16.vlgmr.msrb.gmra.mxu1 %vm845_vm9, %v997_v58  ;;  %v2027_v2 = vpop.eup %2026 }
 0x4fb   : > { %v1118_v3 = vsel %vm845_vm9, %v2027_v2, 0.0 }
 0x4fc   : > { %1304 = vrot.lane.b32.xlu0 %v2349_v1, %s2123_s29 }
 0x4fd   : > { %v1183_v59 = vpop.permute.xlu1 %1182 }
 0x4fe   : > { %v1188_v0 = vsel %vm882_vm10, %v1183_v59, 0 }
 0x505   : > { %v1125_v61 = vpop.permute.xlu1 %1124 }
 0x506   : > { %v1130_v62 = vsel %vm882_vm10, %v1125_v61, 0 }
 0x507   : > { %1139 = vmatpush.bf16.msra.mxu1 %v1130_v62  ;;  %v1997_v62 = vld [vmem:[%s2572_s30] ss:$0 sm:$0xff] }
 0x519   : > { %1119 = vadd.xlane.f32.xlu2 %v1118_v3 }
 0x531   : > { %1243 = vrot.lane.b32.xlu2 %v2349_v1, %s2121_s26  ;;  %s1601_s26 = sld [smem:[#allocation5]] (!%p1927_p5) }
 0x537   : > { %s1602_s29 = scalar_lea.vmem (!%p1927_p5), [#allocation2], %s1601_s26 }
 0x543   : > { %v1056_v4 = vpop.xlane.xlu2 %1055 }
 0x54b   : > { %v932_v6 = vpop.xlane.xlu2 %931 }
 0x54c   : > { %2028 = vrcp.f32 %v932_v6 }
 0x54d   : > { %2030 = vrcp.f32 %v1056_v4 }
 0x552   : > { %v2029_v8 = vpop.eup %2028 }
 0x553   : > { %v934_v9 = vmul.f32 %v2029_v8, %v2017_v36  ;;  %v1061_v10 = vpop.permute.xlu2 %1060  ;;  %v1178_v13 = vpop.xlane.xlu0 %1177 }
 0x554   : > { %v1066_v11 = vsel %vm882_vm10, %v1061_v10, 0  ;;  %v2031_v14 = vpop.eup %2030  ;;  %2032 = vrcp.f32 %v1178_v13 }
 0x555   : > { %v935_v12 = vpack.c.bf16 %v934_v9, %v934_v9  ;;  %1075 = vmatpush.bf16.msrb.mxu2 %v1066_v11  ;;  %v1058_v1 = vmul.f32 %v2031_v14, %v2408_v32 }
 0x557   : > { %1862 = vmatmul.msk.bf16.vlgmr.msra.gmra.mxu2 %vm845_vm9, %v935_v12  ;;  %v1059_v16 = vpack.c.bf16 %v1058_v1, %v1058_v1 }
 0x559   : > { %1197 = vmatpush.bf16.msra.mxu2 %v1188_v0 }
 0x55a   : > { %v2033_v20 = vpop.eup %2032 }
 0x55b   : > { %v1239_v18 = vpop.xlane.xlu0 %1238  ;;  %v1180_v22 = vmul.f32 %v2033_v20, %v2413_v42 }
 0x55d   : > { %v1181_v23 = vpack.c.bf16 %v1180_v22, %v1180_v22  ;;  %v1950_v22 = vld [vmem:[%s2278_s5] sm:$0xff] }
 0x563   : > { %v1300_v24 = vpop.xlane.xlu1 %1299 }
 0x564   : > { %2034 = vrcp.f32 %v1300_v24 }
 0x567   : > { %1866 = vmatmul.msk.bf16.vlgmr.msrb.gmra.mxu2 %vm845_vm9, %v1059_v16 }
 0x56a   : > { %v2035_v26 = vpop.eup %2034 }
 0x56b   : > { %v1302_v28 = vmul.f32 %v2035_v26, %v2023_v50 }
 0x56d   : > { %v1303_v17 = vpack.c.bf16 %v1302_v28, %v1302_v28 }
 0x56e   : > { %v1305_v19 = vpop.permute.xlu0 %1304 }
 0x56f   : > { %v1310_v21 = vsel %vm882_vm10, %v1305_v19, 0 }
 0x570   : > { %1319 = vmatpush.bf16.msrb.mxu2 %v1310_v21 }
 0x577   : > { %v1015_v25 = vpop.f32.mrf.mxu1  ;;  %1870 = vmatmul.msk.bf16.vlgmr.msra.gmra.mxu2 %vm845_vm9, %v1181_v23 }
 0x57f   : > { %v1017_v27 = vpop.f32.mrf.mxu1 }
 0x587   : > { %1874 = vmatmul.msk.bf16.vlgmr.msrb.gmra.mxu2 %vm845_vm9, %v1303_v17 }
 0x58c   : > { %v1120_v29 = vpop.xlane.xlu2 %1119 }
 0x58d   : > { %2036 = vrcp.f32 %v1120_v29 }
 0x58e   : > { %2038 = vrcp.f32 %v1239_v18  ;;  %v1951_v18 = vld [vmem:[%s2278_s5 + $0x8] sm:$0xff]  ;;  %s2575_s5 = sld [smem:[#allocation17_spill]] (!%p1927_p5) }
 0x593   : > { %v2037_v30 = vpop.eup %2036 }
 0x594   : > { %v1122_v31 = vmul.f32 %v2037_v30, %v2027_v2  ;;  %v1244_v32 = vpop.permute.xlu2 %1243  ;;  %v2039_v35 = vpop.eup %2038 }
 0x595   : > { %v1249_v33 = vsel %vm882_vm10, %v1244_v32, 0  ;;  %v1241_v36 = vmul.f32 %v2039_v35, %v2417_v45 }
 0x596   : > { %v1123_v34 = vpack.c.bf16 %v1122_v31, %v1122_v31  ;;  %1258 = vmatpush.bf16.msrb.mxu1 %v1249_v33 }
 0x597   : > { %v1242_v37 = vpack.c.bf16 %v1241_v36, %v1241_v36 }
 0x598   : > { %1868 = vmatmul.msk.bf16.vlgmr.msra.gmra.mxu1 %vm845_vm9, %v1123_v34 }
 0x59a   : > { %1458 = vmatpush.bf16.msra.mxu1 %v1951_v18 }
 0x59e   : > { %1459 = vmatpush.bf16.msra.mxu1 %v1950_v22 }
 0x5a8   : > { %1872 = vmatmul.msk.bf16.vlgmr.msrb.gmra.mxu1 %vm845_vm9, %v1242_v37  ;;  %v1998_v37 = vld [vmem:[%s696_s16] ss:$0 sm:$0xff] }
 0x5da   : > { %v953_v38 = vpop.f32.mrf.mxu2 }
 0x5db   : > { %958 = vrot.lane.b32.xlu0 %v953_v38, %s2124_s1 }
 0x5e2   : > { %v955_v39 = vpop.f32.mrf.mxu2 }
 0x5e3   : > { %1020 = vrot.lane.b32.xlu0 %v1015_v25, %s2125_s7 }
 0x5ea   : > { %v1077_v40 = vpop.f32.mrf.mxu2 }
 0x5eb   : > { %1082 = vrot.lane.b32.xlu0 %v1077_v40, %s2126_s20 }
 0x5f2   : > { %v1079_v41 = vpop.f32.mrf.mxu2 }
 0x5f3   : > { %v1999_v41 = vld [vmem:[%s699_s27] ss:$0 sm:$0xff] }
 0x5fa   : > { %v1199_v42 = vpop.f32.mrf.mxu2 }
 0x5fb   : > { %1204 = vrot.lane.b32.xlu1 %v1199_v42, %s2124_s1 }
 0x602   : > { %v1201_v43 = vpop.f32.mrf.mxu2 }
 0x60a   : > { %v1321_v44 = vpop.f32.mrf.mxu2 }
 0x612   : > { %v1323_v46 = vpop.f32.mrf.mxu2 }
 0x615   : > { %v1141_v47 = vpop.f32.mrf.mxu1 }
 0x616   : > { %1145 = vst.msk [vmem:[#allocation3 + $0x8] sm:$0xff] %vm845_vm9, %v1141_v47 }
 0x61d   : > { %v1143_v45 = vpop.f32.mrf.mxu1 }
 0x625   : > { %v1260_v48 = vpop.f32.mrf.mxu1 }
 0x626   : > { %1265 = vrot.lane.b32.xlu2 %v1260_v48, %s2125_s7  ;;  %v1959_v48 = vld [vmem:[%s2288_s22 + $0x38] sm:$0xff]  ;;  %s2574_s7 = sld [smem:[#allocation19_spill]] (!%p1927_p5) }
 0x627   : > { %1573 = vmatpush.bf16.msrb.mxu3 %v1959_v48 }
 0x62d   : > { %v1262_v49 = vpop.f32.mrf.mxu1 }
 0x62e   : > { %1326 = vrot.lane.b32.xlu2 %v1321_v44, %s2126_s20  ;;  %v1958_v49 = vld [vmem:[%s2288_s22 + $0x30] sm:$0xff] }
 0x62f   : > { %1574 = vmatpush.bf16.msrb.mxu3 %v1958_v49 }
 0x64d   : > { %v959_v50 = vpop.permute.xlu0 %958 }
 0x64e   : > { %962 = vst.msk [vmem:[#allocation3] sm:$0xff] %vm961_vm12, %v959_v50  ;;  %v1957_v50 = vld [vmem:[%s2288_s22 + $0x28] sm:$0xff] }
 0x64f   : > { %1575 = vmatpush.bf16.msrb.mxu3 %v1957_v50 }
 0x655   : > { %v1021_v51 = vpop.permute.xlu0 %1020 }
 0x656   : > { %1024 = vst.msk [vmem:[#allocation3] sm:$0xff] %vm1023_vm13, %v1021_v51  ;;  %v1956_v51 = vld [vmem:[%s2288_s22 + $0x20] sm:$0xff] }
 0x657   : > { %1576 = vmatpush.bf16.msrb.mxu3 %v1956_v51 }
 0x65b   : > { %1577 = vmatpush.bf16.msrb.mxu3 %v1955_v53 }
 0x65d   : > { %v1083_v52 = vpop.permute.xlu0 %1082 }
 0x65e   : > { %1086 = vst.msk [vmem:[#allocation3] sm:$0xff] %vm1085_vm14, %v1083_v52  ;;  %v2000_v52 = vld [vmem:[%s707_s15] ss:$0 sm:$0xff] }
 0x665   : > { %v1330_v58 = vld [vmem:[#allocation3] sm:$0xff] }
 0x66d   : > { %v1205_v55 = vpop.permute.xlu1 %1204 }
 0x66e   : > { %1207 = vst.msk [vmem:[#allocation3 + $0x8] sm:$0xff] %vm961_vm12, %v1205_v55 }
 0x680   : > { %v1266_v56 = vpop.permute.xlu2 %1265 }
 0x681   : > { %1268 = vst.msk [vmem:[#allocation3 + $0x8] sm:$0xff] %vm1023_vm13, %v1266_v56  ;;  %v1954_v56 = vld [vmem:[%s2288_s22 + $0x10] sm:$0xff] }
 0x682   : > { %1578 = vmatpush.bf16.msrb.mxu3 %v1954_v56 }
 0x688   : > { %v1327_v57 = vpop.permute.xlu2 %1326 }
 0x689   : > { %1329 = vst.msk [vmem:[#allocation3 + $0x8] sm:$0xff] %vm1085_vm14, %v1327_v57 }
 0x690   : > { %v1331_v59 = vld [vmem:[#allocation3 + $0x8] sm:$0xff] }
 0x691   : > { %v1332_v61 = vpack.c.bf16 %v1331_v59, %v1330_v58  ;;  %v1953_v59 = vld [vmem:[%s2288_s22 + $0x8] sm:$0xff] }
 0x692   : > { %1579 = vmatpush.bf16.msrb.mxu3 %v1953_v59 }
 0x693   : > { %1883 = vmatmul.msk.bf16.vlgmr.msra.gmra.mxu0 %vm739_vm1, %v1332_v61 }
 0x710   : > { %v1365_v60 = vpop.f32.mrf.mxu0 }
 0x711   : > { %v1366_v63 = vadd.f32 %v1997_v62, %v1365_v60  ;;  %v1952_v60 = vld [vmem:[%s2288_s22] sm:$0xff] }
 0x712   : > { %1580 = vmatpush.bf16.msrb.mxu3 %v1952_v60 }
 0x713   : > { %v2455_v2 = vadd.f32 %v1366_v63, %v2304_v5 }
 0x715   : > { %v1374_v3 = vsel %vm739_vm1, %v2455_v2, 0.0 }
 0x716   : > { %1375 = vadd.xlane.f32.xlu0 %v1374_v3 }
 0x718   : > { %v1367_v4 = vpop.f32.mrf.mxu0 }
 0x719   : > { %v1368_v6 = vadd.f32 %v1997_v62, %v1367_v4 }
 0x71b   : > { %v2460_v8 = vadd.f32 %v1368_v6, %v2308_v7 }
 0x71d   : > { %v1377_v9 = vsel %vm739_vm1, %v2460_v8, 0.0 }
 0x71e   : > { %1378 = vadd.xlane.f32.xlu2 %v1377_v9 }
 0x789   : > { %v1376_v10 = vpop.xlane.xlu0 %1375 }
 0x78a   : > { %v1380_v11 = vmul.f32 %v1376_v10, %v2312_v15 }
 0x78c   : > { %v1382_v5 = vsub.f32 %v2455_v2, %v1380_v11 }
 0x78e   : > { %v1384_v12 = vmul.f32 %v1382_v5, %v1382_v5 }
 0x790   : > { %v1386_v0 = vsel %vm739_vm1, %v1384_v12, 0.0 }
 0x791   : > { %v1379_v13 = vpop.xlane.xlu2 %1378  ;;  %1387 = vadd.xlane.f32.xlu1 %v1386_v0 }
 0x792   : > { %v1381_v14 = vmul.f32 %v1379_v13, %v2312_v15 }
 0x794   : > { %v1383_v7 = vsub.f32 %v2460_v8, %v1381_v14 }
 0x796   : > { %v1385_v1 = vmul.f32 %v1383_v7, %v1383_v7 }
 0x798   : > { %v1389_v16 = vsel %vm739_vm1, %v1385_v1, 0.0 }
 0x799   : > { %1390 = vadd.xlane.f32.xlu0 %v1389_v16 }
 0x804   : > { %v1388_v19 = vpop.xlane.xlu1 %1387 }
 0x805   : > { %v1392_v20 = vmul.f32 %v1388_v19, %v2312_v15 }
 0x807   : > { %v1394_v21 = vadd.f32 1e-05, %v1392_v20 }
 0x809   : > { %2040 = vrsqrt.f32 %v1394_v21  ;;  %vm1402_vm0 = vweird.f32 %v1394_v21 }
 0x80c   : > { %v1391_v23 = vpop.xlane.xlu0 %1390 }
 0x80d   : > { %v1393_v24 = vmul.f32 %v1391_v23, %v2312_v15 }
 0x80f   : > { %v2041_v25 = vpop.eup %2040  ;;  %v1395_v26 = vadd.f32 1e-05, %v1393_v24 }
 0x810   : > { %v1397_v27 = vmul.f32 %v2041_v25, %v1394_v21  ;;  %vm1403_vm15 = vweird.f32 %v2041_v25 }
 0x811   : > { %2042 = vrsqrt.f32 %v1395_v26  ;;  %vm1404_vm2 = vmor %vm1402_vm0, %vm1403_vm15  ;;  %vm1412_vm4 = vweird.f32 %v1395_v26 }
 0x812   : > { %v1398_v28 = vmul.f32 %v2041_v25, %v1397_v27 }
 0x814   : > { %v1399_v17 = vmul.f32 0.5, %v1398_v28 }
 0x816   : > { %v1400_v29 = vsub.f32 1.5, %v1399_v17 }
 0x817   : > { %v2043_v30 = vpop.eup %2042 }
 0x818   : > { %v1401_v31 = vmul.f32 %v2041_v25, %v1400_v29  ;;  %v1407_v32 = vmul.f32 %v2043_v30, %v1395_v26  ;;  %vm1413_vm3 = vweird.f32 %v2043_v30 }
 0x819   : > { %vm1414_vm5 = vmor %vm1412_vm4, %vm1413_vm3 }
 0x81a   : > { %v1408_v33 = vmul.f32 %v2043_v30, %v1407_v32  ;;  %v1405_v34 = vsel %vm1404_vm2, %v2041_v25, %v1401_v31  ;;  %v2001_v31 = vld [vmem:[%s715_s25] ss:$0 sm:$0xff] }
 0x81b   : > { %v1416_v38 = vmul.f32 %v1405_v34, %v1382_v5 }
 0x81c   : > { %v1409_v35 = vmul.f32 0.5, %v1408_v33 }
 0x81d   : > { %v1421_v42 = vmul.f32 %v1998_v37, %v1416_v38 }
 0x81e   : > { %v1410_v36 = vsub.f32 1.5, %v1409_v35 }
 0x81f   : > { %v1426_v46 = vadd.f32 %v1999_v41, %v1421_v42 }
 0x820   : > { %v1411_v39 = vmul.f32 %v2043_v30, %v1410_v36 }
 0x822   : > { %v1415_v40 = vsel %vm1414_vm5, %v2043_v30, %v1411_v39 }
 0x823   : > { %v1417_v43 = vmul.f32 %v1415_v40, %v1383_v7 }
 0x825   : > { %v1422_v44 = vmul.f32 %v1998_v37, %v1417_v43 }
 0x827   : > { %v1427_v47 = vadd.f32 %v1999_v41, %v1422_v44 }
 0x829   : > { %v1428_v45 = vpack.c.bf16 %v1427_v47, %v1426_v46 }
 0x82b   : > { %1892 = vmatmul.msk.bf16.vlgmr.msra.gmra.mxu1 %vm739_vm1, %v1428_v45 }
 0x8a8   : > { %v1461_v54 = vpop.f32.mrf.mxu1 }
 0x8a9   : > { %v1462_v55 = vadd.f32 %v2000_v52, %v1461_v54 }
 0x8ab   : > { %v1893_v57 = vmul.f32 -1.702, %v1462_v55 }
 0x8ad   : > { %v1470_v58 = vmul.f32 1.442695, %v1893_v57 }
 0x8af   : > { %2044 = vpow2.f32 %v1470_v58 }
 0x8b0   : > { %v1463_v61 = vpop.f32.mrf.mxu1 }
 0x8b1   : > { %v1464_v62 = vadd.f32 %v2000_v52, %v1463_v61 }
 0x8b3   : > { %v1894_v63 = vmul.f32 -1.702, %v1464_v62 }
 0x8b5   : > { %v2045_v3 = vpop.eup %2044  ;;  %v1472_v4 = vmul.f32 1.442695, %v1894_v63 }
 0x8b6   : > { %v1474_v6 = vadd.f32 1.0, %v2045_v3 }
 0x8b7   : > { %2046 = vpow2.f32 %v1472_v4 }
 0x8b8   : > { %2048 = vrcp.f32 %v1474_v6  ;;  %v1487_v1 = vand.u32 2147483648, %v1474_v6  ;;  %vm1481_vm7 = vweird.f32 %v1474_v6  ;;  %v1485_v16 = vand.u32 2147483647, %v1474_v6 }
 0x8ba   : > { %v1488_v23 = vor.u32 1.1754944e-38, %v1487_v1  ;;  %vm1486_vm10 = vcmp.eq.f32.partialorder %v1485_v16, 8.507059e+37 }
 0x8bd   : > { %v2047_v9 = vpop.eup %2046 }
 0x8be   : > { %v2049_v10 = vpop.eup %2048  ;;  %v1475_v11 = vadd.f32 1.0, %v2047_v9 }
 0x8bf   : > { %v1477_v5 = vmul.f32 %v2049_v10, %v1474_v6  ;;  %vm1482_vm6 = vweird.f32 %v2049_v10 }
 0x8c0   : > { %2050 = vrcp.f32 %v1475_v11  ;;  %vm1483_vm8 = vmor %vm1481_vm7, %vm1482_vm6  ;;  %v1502_v19 = vand.u32 2147483648, %v1475_v11  ;;  %v1500_v22 = vand.u32 2147483647, %v1475_v11  ;;  %vm1496_vm11 = vweird.f32 %v1475_v11 }
 0x8c1   : > { %v1478_v12 = vsub.f32 1.0, %v1477_v5 }
 0x8c2   : > { %v1503_v26 = vor.u32 1.1754944e-38, %v1502_v19  ;;  %vm1501_vm13 = vcmp.eq.f32.partialorder %v1500_v22, 8.507059e+37 }
 0x8c3   : > { %v1479_v0 = vmul.f32 %v2049_v10, %v1478_v12 }
 0x8c5   : > { %v1480_v14 = vadd.f32 %v2049_v10, %v1479_v0 }
 0x8c6   : > { %v2051_v13 = vpop.eup %2050 }
 0x8c7   : > { %v1492_v7 = vmul.f32 %v2051_v13, %v1475_v11  ;;  %v1484_v20 = vsel %vm1483_vm8, %v2049_v10, %v1480_v14  ;;  %vm1497_vm9 = vweird.f32 %v2051_v13 }
 0x8c8   : > { %v1489_v25 = vsel %vm1486_vm10, %v1488_v23, %v1484_v20  ;;  %vm1498_vm12 = vmor %vm1496_vm11, %vm1497_vm9 }
 0x8c9   : > { %v1493_v18 = vsub.f32 1.0, %v1492_v7  ;;  %v1506_v17 = vmul.f32 %v1489_v25, %v1462_v55 }
 0x8cb   : > { %v1494_v21 = vmul.f32 %v2051_v13, %v1493_v18 }
 0x8cd   : > { %v1495_v24 = vadd.f32 %v2051_v13, %v1494_v21 }
 0x8cf   : > { %v1499_v27 = vsel %vm1498_vm12, %v2051_v13, %v1495_v24 }
 0x8d0   : > { %v1504_v28 = vsel %vm1501_vm13, %v1503_v26, %v1499_v27 }
 0x8d1   : > { %v1507_v29 = vmul.f32 %v1504_v28, %v1464_v62 }
 0x8d3   : > { %v1508_v30 = vpack.c.bf16 %v1507_v29, %v1506_v17 }
 0x8d5   : > { %1581 = vmatmul.bf16.vlgmr.msrb.gmra.mxu3 %v1508_v30 }
 0x958   : > { %v1582_v32 = vpop.f32.mrf.mxu3 }
 0x959   : > { %v1587_v33 = vadd.f32 %v1582_v32, %v2455_v2 }
 0x95b   : > { %v1593_v34 = vadd.f32 %v2001_v31, %v1587_v33 }
 0x95d   : > { %1595 = vst.msk [vmem:[#allocation2] sm:$0xff] %vm739_vm1, %v1593_v34 }
 0x960   : > { %v1584_v35 = vpop.f32.mrf.mxu3 }
 0x961   : > { %v1588_v36 = vadd.f32 %v1584_v35, %v2460_v8  ;;  %1600 = sbr.rel (%p1927_p5) target bundleno = 2821 (0xb05), region = 96 }
 0x963   : > { %v1594_v37 = vadd.f32 %v2001_v31, %v1588_v36 }
 0x965   : > { %1596 = vst.msk [vmem:[#allocation2 + $0x8] sm:$0xff] %vm739_vm1, %v1594_v37 }
 0x966   : > { %vm1610_vm14 = vcmask 1040384   ;;  %vm1614_vm15 = vcmask 254976   ;;  %v1961_v47 = vld [vmem:[%s2574_s7 + $0x8] sm:$0xff]  ;;  %v1960_v45 = vld [vmem:[%s2574_s7] sm:$0xff] }
 0x967   : > { %1671 = vmatpush.bf16.msra.mxu0 %v1961_v47  ;;  %v2052_v57 = vld [vmem:[%s2575_s5] ss:$0 sm:$0xff] }
 0x96b   : > { %1672 = vmatpush.bf16.msra.mxu0 %v1960_v45 }
 0x96c   : > { %v1603_v38 = vld [vmem:[%s1602_s29] sm:$0x1] }
 0x96d   : > { %v1606_v39 = vld [vmem:[%s1605_s12] sm:$0x1] }
 0x96e   : > { %v1608_v2 = vrot.slane %v1606_v39, 7 }
 0x970   : > { %v1611_v40 = vsel %vm1610_vm14, %v1603_v38, %v1608_v2 }
 0x971   : > { %v1615_v41 = vsel %vm1614_vm15, %v1611_v40, 0.0 }
 0x972   : > { %1616 = vadd.xlane.f32.xlu0 %v1615_v41 }
 0x9e5   : > { %v1617_v42 = vpop.xlane.xlu0 %1616 }
 0x9e6   : > { %v1618_v8 = vmul.f32 %v1617_v42, %v2312_v15 }
 0x9e8   : > { %v1619_v43 = vsub.f32 %v1611_v40, %v1618_v8 }
 0x9ea   : > { %v1620_v44 = vmul.f32 %v1619_v43, %v1619_v43 }
 0x9ec   : > { %v1621_v46 = vsel %vm1614_vm15, %v1620_v44, 0.0 }
 0x9ed   : > { %1622 = vadd.xlane.f32.xlu0 %v1621_v46 }
 0xa60   : > { %v1623_v48 = vpop.xlane.xlu0 %1622 }
 0xa61   : > { %v1624_v49 = vmul.f32 %v1623_v48, %v2312_v15  ;;  %v2053_v15 = vld [vmem:[%s2576_s23] ss:$0 sm:$0xff] }
 0xa63   : > { %v1625_v50 = vadd.f32 1e-05, %v1624_v49 }
 0xa65   : > { %2054 = vrsqrt.f32 %v1625_v50  ;;  %vm1632_vm2 = vweird.f32 %v1625_v50 }
 0xa6b   : > { %v2055_v51 = vpop.eup %2054 }
 0xa6c   : > { %v1627_v52 = vmul.f32 %v2055_v51, %v1625_v50  ;;  %vm1633_vm0 = vweird.f32 %v2055_v51 }
 0xa6d   : > { %vm1634_vm3 = vmor %vm1632_vm2, %vm1633_vm0 }
 0xa6e   : > { %v1628_v53 = vmul.f32 %v2055_v51, %v1627_v52 }
 0xa70   : > { %v1629_v54 = vmul.f32 0.5, %v1628_v53 }
 0xa72   : > { %v1630_v55 = vsub.f32 1.5, %v1629_v54 }
 0xa74   : > { %v1631_v56 = vmul.f32 %v2055_v51, %v1630_v55 }
 0xa76   : > { %v1635_v58 = vsel %vm1634_vm3, %v2055_v51, %v1631_v56 }
 0xa77   : > { %v1636_v59 = vmul.f32 %v1635_v58, %v1619_v43 }
 0xa79   : > { %v1640_v61 = vmul.f32 %v2052_v57, %v1636_v59 }
 0xa7b   : > { %v1644_v62 = vadd.f32 %v2053_v15, %v1640_v61 }
 0xa7d   : > { %v1645_v60 = vpack.c.bf16 %v1644_v62, %v1644_v62 }
 0xa7f   : > { %1937 = vmatmul.msk.bf16.vlgmr.msra.gmra.mxu0 %vm739_vm1, %v1645_v60 }
 0xafc   : > { %v1674_v63 = vpop.f32.mrf.mxu0 }
 0xafd   : > { %1678 = vst [vmem:[#allocation6] sm:$0x3] %v1674_v63 }
 0xb04   : > { %v1676_v3 = vpop.f32.mrf.mxu0 }
 0xb05 PF: > { %p1966_p6 = scmp.eq.s32.totalorder %s2232_s19, 1  ;;  %s2127_s16 = smov [#allocation6]  }
 0xb06   : > { %s1685_s27 = sshll.u32 %s2127_s16, 4  ;;  %s2577_s22 = sld [smem:[#allocation20_spill]]  ;;  %s1686_s27 = int_to_ptr.vmem [resolvable:$true] %s1685_s27 }
 0xb0c   : > { %s1687_s26 = sshll.u32 %s2577_s22, 4  ;;  %s1688_s26 = int_to_ptr.hbm [resolvable:$true] %s1687_s26 }
 0xb0d   : > { %1963 = dma.vmem_to_hbm [thread:$0]  (%p1966_p6), %s1686_s27, 32, %s1688_s26, [#allocation7]  }
 0xb0e   : > { %2103 = dma.done.wait (%p1966_p6), [#allocation7], 32  }
 0xb0f   : > { %2105 = vsyncadd (%p1966_p6), [#allocation7], 4294967264 }
 0xb10 PF: > { %s2578_s24 = sld [smem:[#allocation10_spill]] }
 0xb16   : > { %s37_s0 = sadd.s32 1, %s2578_s24  }
 0xb17   : > { %p34_p7 = scmp.ge.s32.totalorder %s37_s0, 4  }
 0xb19   :  { %36 = sbr.rel (!%p34_p7) target bundleno = 23 (0x17), region = 158 }
 0xb1e   :  { %1701 = vsyncpa [#allocation7], 1 }
 0xb1f   :  { %1703 = vsyncpa [#allocation7 + $0x1], 1 }

</bundles_post_ra>
